<compile_context>
chip_gen: v5e
topology: v5e:2x2
jax: 0.10.0
libtpu: 0.0.40
codegen_flags: <defaults>
</compile_context>

<pallas_src>
import functools
import math

import jax
import jax.numpy as jnp
from jax.experimental import pallas as pl
from jax.experimental.pallas import tpu as pltpu


# ----------------------------------------------------------------------------
# Fused kernel: one batch-block per grid step.
#   x block:     (Bb, T, E)     f32 activations
#   w_in block:  (E, 3E) bf16   (pre-transposed in-proj weight, full block)
#   b_in block:  (1, 3E) f32
#   w_out block: (E, E)  bf16   (pre-transposed out-proj weight, full block)
#   b_out block: (1, E)  f32
#   out block:   (Bb, T, E)     f32, lane-dense
#   attn block:  (Bb, T, H*T)   f32, lane-dense ([batch, query, head*T + key])
# ----------------------------------------------------------------------------
def _fused_mha_kernel(x_ref, w_in_ref, b_in_ref, w_out_ref, b_out_ref,
                      out_ref, attn_ref, *, num_heads, head_dim, scale,
                      masked_col):
    f32 = jnp.float32
    bf16 = jnp.bfloat16
    Bb, T, E = x_ref.shape

    # ---- QKV projection: one MXU matmul for the whole batch block ----------
    x2d = x_ref[...].reshape(Bb * T, E)                      # merge leading dims
    qkv = jnp.dot(x2d.astype(bf16), w_in_ref[...],
                  preferred_element_type=f32)                # (Bb*T, 3E) f32
    qkv = qkv + b_in_ref[...].astype(f32)

    # 128-aligned lane splits of the packed q|k|v slab.
    q_all = qkv[:, :E].reshape(Bb, T, E)
    k_all = qkv[:, E:2 * E].reshape(Bb, T, E)
    v_all = qkv[:, 2 * E:3 * E].reshape(Bb, T, E)

    # Additive mask applied BEFORE the row max (matches reference -inf path,
    # avoids 0-denominator / NaN when the masked score dominates).
    add_mask = None
    if masked_col is not None:
        col = jax.lax.broadcasted_iota(jnp.int32, (1, T, T), 2)
        add_mask = jnp.where(col == masked_col,
                             jnp.float32(-1e30), jnp.float32(0.0))

    # TODO(synk): convert to lax.fori_loop / a grid axis if H or T grows large
    # (static unroll is fine at H=8, T=8 but will spill vregs at T>=128).
    ctx_heads = []
    attn_heads = []
    for h in range(num_heads):
        lo = h * head_dim
        hi = lo + head_dim
        q = q_all[:, :, lo:hi].astype(bf16)                  # (Bb, T, Dh)
        k = k_all[:, :, lo:hi].astype(bf16)
        v = v_all[:, :, lo:hi].astype(bf16)

        # scores = q @ k^T / sqrt(Dh), batched over the batch dim.
        s = jax.lax.dot_general(q, k, (((2,), (2,)), ((0,), (0,))),
                                preferred_element_type=f32) * scale  # (Bb,T,T)
        if add_mask is not None:
            s = s + add_mask

        m = jnp.max(s, axis=-1, keepdims=True)
        e = jnp.exp(s - m)                                   # masked col -> 0
        denom = jnp.sum(e, axis=-1, keepdims=True)
        r = pl.reciprocal(denom, approx=True)                # EUP slot
        r = r * (2.0 - denom * r)                            # Newton -> ~f32 exact
        attn = e * r                                         # (Bb, T, T) f32 probs

        ctx = jax.lax.dot_general(attn.astype(bf16), v,
                                  (((2,), (1,)), ((0,), (0,))),
                                  preferred_element_type=f32)  # (Bb, T, Dh)
        ctx_heads.append(ctx)
        attn_heads.append(attn)

    # Lane-dense stores: one (Bb,T,E) context slab, one (Bb,T,H*T) weight slab.
    ctx_full = jnp.concatenate(ctx_heads, axis=-1)           # (Bb, T, E) f32
    attn_ref[...] = jnp.concatenate(attn_heads, axis=-1).astype(attn_ref.dtype)

    # ---- Output projection --------------------------------------------------
    out = jnp.dot(ctx_full.reshape(Bb * T, E).astype(bf16), w_out_ref[...],
                  preferred_element_type=f32)
    out = out + b_out_ref[...].astype(f32)
    out_ref[...] = out.reshape(Bb, T, E).astype(out_ref.dtype)


def _pick_batch_block(B, T, E, H, budget_bytes=4 * 1024 * 1024):
    """Batches per grid step: as many as fit a small VMEM budget (v7x-safe),
    while leaving >= 2 grid steps for megacore when B permits."""
    per_b = 4 * (2 * T * E + T * H * T + 2 * 3 * T * E)      # rough f32 bytes
    cap = max(1, budget_bytes // max(per_b, 1))
    if B >= 2:
        cap = min(cap, B // 2)
    bb = 1
    for d in range(1, min(B, cap) + 1):
        if B % d == 0:
            bb = d
    return bb


def pallas_mha(x_bm, w_in_t, b_in, w_out_t, b_out, num_heads, head_dim,
               masked_col):
    """x_bm: (B, T, E) batch-major f32.  Returns (out (B,T,E), attn (B,T,H*T))."""
    B, T, E = x_bm.shape
    H = num_heads
    bb = _pick_batch_block(B, T, E, H)

    kernel = functools.partial(
        _fused_mha_kernel, num_heads=H, head_dim=head_dim,
        scale=1.0 / math.sqrt(head_dim), masked_col=masked_col)

    out, attn_flat = pl.pallas_call(
        kernel,
        out_shape=(
            jax.ShapeDtypeStruct((B, T, E), x_bm.dtype),
            jax.ShapeDtypeStruct((B, T, H * T), x_bm.dtype),
        ),
        grid=(B // bb,),
        in_specs=[
            pl.BlockSpec((bb, T, E), lambda b: (b, 0, 0)),
            pl.BlockSpec((E, 3 * E), lambda b: (0, 0)),     # weights stay resident
            pl.BlockSpec((1, 3 * E), lambda b: (0, 0)),
            pl.BlockSpec((E, E), lambda b: (0, 0)),
            pl.BlockSpec((1, E), lambda b: (0, 0)),
        ],
        out_specs=(
            pl.BlockSpec((bb, T, E), lambda b: (b, 0, 0)),
            pl.BlockSpec((bb, T, H * T), lambda b: (b, 0, 0)),
        ),
        compiler_params=pltpu.CompilerParams(
            dimension_semantics=("parallel",),
            vmem_limit_bytes=32 * 1024 * 1024),
    )(x_bm, w_in_t, b_in, w_out_t, b_out)
    return out, attn_flat


# ----------------------------------------------------------------------------
# Module wrapper
# ----------------------------------------------------------------------------
class MultiheadAttentionPallas:
    def __init__(self, embed_dim, num_heads, masked_time_series,
                 dropout=0.0, bias=True, key=None):
        assert embed_dim % num_heads == 0, 'embed_dim must be divisible by num_heads'
        self.embed_dim = embed_dim
        self.num_heads = num_heads
        self.head_dim = embed_dim // num_heads
        self.masked_time_series = masked_time_series
        # TODO(synk): training-mode dropout on attention weights not implemented
        # (inference path; p=0.0 is identity like the reference in eval mode).
        self.dropout = dropout

        key = jax.random.PRNGKey(0) if key is None else key
        k1, k2, k3 = jax.random.split(key, 3)

        # xavier_uniform for in_proj_weight (3E, E), zero in_proj_bias.
        fan_in, fan_out = embed_dim, 3 * embed_dim
        xav = math.sqrt(6.0 / (fan_in + fan_out))
        self.in_proj_weight = jax.random.uniform(
            k1, (3 * embed_dim, embed_dim), jnp.float32, -xav, xav)
        self.in_proj_bias = (jnp.zeros((3 * embed_dim,), jnp.float32)
                             if bias else None)

        # out_proj: nn.Linear default-style init.
        bound = 1.0 / math.sqrt(embed_dim)
        self.out_proj_weight = jax.random.uniform(
            k2, (embed_dim, embed_dim), jnp.float32, -bound, bound)
        self.out_proj_bias = (jax.random.uniform(
            k3, (embed_dim,), jnp.float32, -bound, bound) if bias else None)

        # Kernel-friendly copies, computed ONCE here: pre-transposed and
        # pre-cast to bf16 (MXU operands), biases kept f32.
        E = embed_dim
        self._w_in_t = jnp.asarray(self.in_proj_weight.T, jnp.bfloat16)   # (E, 3E)
        self._w_out_t = jnp.asarray(self.out_proj_weight.T, jnp.bfloat16) # (E, E)
        self._b_in = (self.in_proj_bias if bias
                      else jnp.zeros((3 * E,), jnp.float32)).reshape(1, 3 * E)
        self._b_out = (self.out_proj_bias if bias
                       else jnp.zeros((E,), jnp.float32)).reshape(1, E)

    def __call__(self, query, key=None, value=None,
                 attn_mask=None, key_padding_mask=None):
        # TODO(synk): attn_mask / key_padding_mask runtime masks not supported
        # (reference forward's None path only).
        assert attn_mask is None and key_padding_mask is None
        T, B, E = query.shape
        assert E == self.embed_dim
        H, Dh = self.num_heads, self.head_dim
        if self.masked_time_series is not None:
            assert self.masked_time_series < T

        # Single cheap layout transpose up front -> batch-major everywhere.
        x = jnp.transpose(query, (1, 0, 2))                             # (B, T, E)

        out_bm, attn_flat = pallas_mha(
            x, self._w_in_t, self._b_in, self._w_out_t, self._b_out,
            H, Dh, self.masked_time_series)

        out = jnp.transpose(out_bm, (1, 0, 2))                          # (T, B, E)
        # (B, T, H*T) lane-dense kernel output -> (B, H, T, T) outside the kernel.
        attn_w = attn_flat.reshape(B, T, H, T).transpose(0, 2, 1, 3)
        return out, attn_w


# ----------------------------------------------------------------------------
# Pure-JAX reference of the PyTorch forward (high precision) for validation.
# ----------------------------------------------------------------------------
def reference_forward(query, w_in, b_in, w_out, b_out, num_heads, masked_col):
    hi = jax.lax.Precision.HIGHEST
    T, B, E = query.shape
    H = num_heads
    Dh = E // H
    qkv = jnp.einsum('tbe,fe->tbf', query, w_in, precision=hi) + b_in
    q, k, v = jnp.split(qkv, 3, axis=-1)

    def shape(x):
        return x.reshape(T, B, H, Dh).transpose(1, 2, 0, 3)             # (B,H,T,Dh)

    q, k, v = shape(q), shape(k), shape(v)
    s = jnp.einsum('bhqd,bhkd->bhqk', q, k, precision=hi) / math.sqrt(Dh)
    if masked_col is not None:
        s = s.at[:, :, :, masked_col].set(-jnp.inf)
    w = jax.nn.softmax(s, axis=-1)
    o = jnp.einsum('bhqk,bhkd->bhqd', w, v, precision=hi)
    o = o.transpose(0, 2, 1, 3).reshape(B, T, E).transpose(1, 0, 2)     # (T,B,E)
    out = jnp.einsum('tbe,fe->tbf', o, w_out, precision=hi) + b_out
    return out, w


# ----------------------------------------------------------------------------
if __name__ == "__main__":
    T, B, E, H = 8, 4, 128, 8       # seq, batch, embed_dim, num_heads
    masked_time_series = 3

    rng = jax.random.PRNGKey(0)
    kx, kp = jax.random.split(rng)
    query = jax.random.normal(kx, (T, B, E), jnp.float32)

    mha = MultiheadAttentionPallas(E, H, masked_time_series, dropout=0.0,
                                   bias=True, key=kp)

    out, attn_w = mha(query, query, query)
    jax.block_until_ready((out, attn_w))

    assert out.shape == (T, B, E)
    assert attn_w.shape == (B, H, T, T)

    # masked column has exactly zero attention probability everywhere
    assert bool(jnp.all(attn_w[:, :, :, masked_time_series] == 0.0))
    # softmax rows sum to 1
    assert bool(jnp.allclose(jnp.sum(attn_w, axis=-1), 1.0, atol=1e-3))

    # end-to-end check against a pure-JAX reference of the PyTorch forward
    # (tolerances accommodate bf16 MXU operands with f32 accumulation)
    ref_out, ref_w = reference_forward(
        query, mha.in_proj_weight, mha.in_proj_bias,
        mha.out_proj_weight, mha.out_proj_bias, H, masked_time_series)
    assert bool(jnp.allclose(attn_w, ref_w, atol=2e-2, rtol=2e-2))
    assert bool(jnp.allclose(out, ref_out, atol=3e-2, rtol=3e-2))

    print("KERNEL_OK")
</pallas_src>

<mosaic_0001>
module attributes {stable_mosaic.version = 11 : i64} {
  func.func @_fused_mha_kernel(%arg0: i32, %arg1: memref<2x8x128xf32, #tpu.memory_space<vmem>>, %arg2: memref<128x384xbf16, #tpu.memory_space<vmem>>, %arg3: memref<1x384xf32, #tpu.memory_space<vmem>>, %arg4: memref<128x128xbf16, #tpu.memory_space<vmem>>, %arg5: memref<1x128xf32, #tpu.memory_space<vmem>>, %arg6: memref<2x8x128xf32, #tpu.memory_space<vmem>>, %arg7: memref<2x8x64xf32, #tpu.memory_space<vmem>>) attributes {dimension_semantics = [#tpu.dimension_semantics<parallel>], iteration_bounds = array<i64: 2>, scalar_prefetch = 0 : i64, scratch_operands = 0 : i64, tpu.core_type = #tpu.core_type<tc>, window_params = [{transform_indices = @transform_0, window_bounds = array<i64: 2, 8, 128>}, {pipeline_mode = #tpu.pipeline_mode<synchronous>, transform_indices = @transform_1, window_bounds = array<i64: 128, 384>}, {pipeline_mode = #tpu.pipeline_mode<synchronous>, transform_indices = @transform_2, window_bounds = array<i64: 1, 384>}, {pipeline_mode = #tpu.pipeline_mode<synchronous>, transform_indices = @transform_3, window_bounds = array<i64: 128, 128>}, {pipeline_mode = #tpu.pipeline_mode<synchronous>, transform_indices = @transform_4, window_bounds = array<i64: 1, 128>}, {transform_indices = @transform_5, window_bounds = array<i64: 2, 8, 128>}, {transform_indices = @transform_6, window_bounds = array<i64: 2, 8, 64>}]} {
    %c0 = arith.constant 0 : index
    %c0_0 = arith.constant 0 : index
    %c0_1 = arith.constant 0 : index
    %0 = vector.load %arg1[%c0, %c0_0, %c0_1] : memref<2x8x128xf32, #tpu.memory_space<vmem>>, vector<2x8x128xf32>
    %1 = vector.shape_cast %0 : vector<2x8x128xf32> to vector<16x128xf32>
    %2 = arith.truncf %1 : vector<16x128xf32> to vector<16x128xbf16>
    %c0_2 = arith.constant 0 : index
    %c0_3 = arith.constant 0 : index
    %3 = vector.load %arg2[%c0_2, %c0_3] : memref<128x384xbf16, #tpu.memory_space<vmem>>, vector<128x384xbf16>
    %cst = arith.constant dense<0.000000e+00> : vector<16x384xf32>
    %4 = tpu.matmul %2, %3, %cst {dimension_numbers = #tpu.dot_dimension_numbers<[1], [0], [0], [1], [0, 0, 1, 1], [], []>} : vector<16x128xbf16>, vector<128x384xbf16>, vector<16x384xf32> -> vector<16x384xf32>
    %c0_4 = arith.constant 0 : index
    %c0_5 = arith.constant 0 : index
    %5 = vector.load %arg3[%c0_4, %c0_5] : memref<1x384xf32, #tpu.memory_space<vmem>>, vector<1x384xf32>
    %6 = vector.broadcast %5 : vector<1x384xf32> to vector<16x384xf32>
    %7 = arith.addf %4, %6 : vector<16x384xf32>
    %8 = vector.extract_strided_slice %7 {offsets = [0, 0], sizes = [16, 128], strides = [1, 1]} : vector<16x384xf32> to vector<16x128xf32>
    %9 = vector.shape_cast %8 : vector<16x128xf32> to vector<2x8x128xf32>
    %10 = vector.extract_strided_slice %7 {offsets = [0, 128], sizes = [16, 128], strides = [1, 1]} : vector<16x384xf32> to vector<16x128xf32>
    %11 = vector.shape_cast %10 : vector<16x128xf32> to vector<2x8x128xf32>
    %12 = vector.extract_strided_slice %7 {offsets = [0, 256], sizes = [16, 128], strides = [1, 1]} : vector<16x384xf32> to vector<16x128xf32>
    %13 = vector.shape_cast %12 : vector<16x128xf32> to vector<2x8x128xf32>
    %14 = tpu.iota {dimensions = array<i32: 2>} : vector<1x8x8xi32>
    %c3_i32 = arith.constant 3 : i32
    %15 = vector.broadcast %c3_i32 : i32 to vector<1x8x8xi32>
    %16 = arith.cmpi eq, %14, %15 : vector<1x8x8xi32>
    %cst_6 = arith.constant -1.000000e+30 : f32
    %cst_7 = arith.constant 0.000000e+00 : f32
    %17 = vector.broadcast %cst_6 : f32 to vector<1x8x8xf32>
    %18 = vector.broadcast %cst_7 : f32 to vector<1x8x8xf32>
    %19 = arith.select %16, %17, %18 : vector<1x8x8xi1>, vector<1x8x8xf32>
    %20 = vector.extract_strided_slice %9 {offsets = [0, 0, 0], sizes = [2, 8, 16], strides = [1, 1, 1]} : vector<2x8x128xf32> to vector<2x8x16xf32>
    %21 = arith.truncf %20 : vector<2x8x16xf32> to vector<2x8x16xbf16>
    %22 = vector.extract_strided_slice %11 {offsets = [0, 0, 0], sizes = [2, 8, 16], strides = [1, 1, 1]} : vector<2x8x128xf32> to vector<2x8x16xf32>
    %23 = arith.truncf %22 : vector<2x8x16xf32> to vector<2x8x16xbf16>
    %24 = vector.extract_strided_slice %13 {offsets = [0, 0, 0], sizes = [2, 8, 16], strides = [1, 1, 1]} : vector<2x8x128xf32> to vector<2x8x16xf32>
    %25 = arith.truncf %24 : vector<2x8x16xf32> to vector<2x8x16xbf16>
    %cst_8 = arith.constant dense<0.000000e+00> : vector<2x8x8xf32>
    %26 = tpu.matmul %21, %23, %cst_8 {dimension_numbers = #tpu.dot_dimension_numbers<[2], [2], [1], [1], [0, 0, 0, 1, 1, 1], [0], [0]>} : vector<2x8x16xbf16>, vector<2x8x16xbf16>, vector<2x8x8xf32> -> vector<2x8x8xf32>
    %cst_9 = arith.constant 2.500000e-01 : f32
    %27 = vector.broadcast %cst_9 : f32 to vector<2x8x8xf32>
    %28 = arith.mulf %26, %27 : vector<2x8x8xf32>
    %29 = vector.broadcast %19 : vector<1x8x8xf32> to vector<2x8x8xf32>
    %30 = arith.addf %28, %29 : vector<2x8x8xf32>
    %cst_10 = arith.constant dense<0xFF800000> : vector<2x8xf32>
    %31 = vector.multi_reduction <maximumf>, %30, %cst_10 [2] : vector<2x8x8xf32> to vector<2x8xf32>
    %32 = vector.shape_cast %31 : vector<2x8xf32> to vector<2x8x1xf32>
    %33 = vector.broadcast %32 : vector<2x8x1xf32> to vector<2x8x8xf32>
    %34 = arith.subf %30, %33 : vector<2x8x8xf32>
    %35 = math.exp %34 : vector<2x8x8xf32>
    %cst_11 = arith.constant dense<0.000000e+00> : vector<2x8xf32>
    %36 = vector.multi_reduction <add>, %35, %cst_11 [2] : vector<2x8x8xf32> to vector<2x8xf32>
    %37 = vector.shape_cast %36 : vector<2x8xf32> to vector<2x8x1xf32>
    %38 = tpu.reciprocal %37 {approx = true} : vector<2x8x1xf32> -> vector<2x8x1xf32>
    %39 = arith.mulf %37, %38 : vector<2x8x1xf32>
    %cst_12 = arith.constant 2.000000e+00 : f32
    %40 = vector.broadcast %cst_12 : f32 to vector<2x8x1xf32>
    %41 = arith.subf %40, %39 : vector<2x8x1xf32>
    %42 = arith.mulf %38, %41 : vector<2x8x1xf32>
    %43 = vector.broadcast %42 : vector<2x8x1xf32> to vector<2x8x8xf32>
    %44 = arith.mulf %35, %43 : vector<2x8x8xf32>
    %45 = arith.truncf %44 : vector<2x8x8xf32> to vector<2x8x8xbf16>
    %cst_13 = arith.constant dense<0.000000e+00> : vector<2x8x16xf32>
    %46 = tpu.matmul %45, %25, %cst_13 {dimension_numbers = #tpu.dot_dimension_numbers<[2], [1], [1], [2], [0, 0, 0, 1, 1, 2], [0], [0]>} : vector<2x8x8xbf16>, vector<2x8x16xbf16>, vector<2x8x16xf32> -> vector<2x8x16xf32>
    %47 = vector.extract_strided_slice %9 {offsets = [0, 0, 16], sizes = [2, 8, 16], strides = [1, 1, 1]} : vector<2x8x128xf32> to vector<2x8x16xf32>
    %48 = arith.truncf %47 : vector<2x8x16xf32> to vector<2x8x16xbf16>
    %49 = vector.extract_strided_slice %11 {offsets = [0, 0, 16], sizes = [2, 8, 16], strides = [1, 1, 1]} : vector<2x8x128xf32> to vector<2x8x16xf32>
    %50 = arith.truncf %49 : vector<2x8x16xf32> to vector<2x8x16xbf16>
    %51 = vector.extract_strided_slice %13 {offsets = [0, 0, 16], sizes = [2, 8, 16], strides = [1, 1, 1]} : vector<2x8x128xf32> to vector<2x8x16xf32>
    %52 = arith.truncf %51 : vector<2x8x16xf32> to vector<2x8x16xbf16>
    %cst_14 = arith.constant dense<0.000000e+00> : vector<2x8x8xf32>
    %53 = tpu.matmul %48, %50, %cst_14 {dimension_numbers = #tpu.dot_dimension_numbers<[2], [2], [1], [1], [0, 0, 0, 1, 1, 1], [0], [0]>} : vector<2x8x16xbf16>, vector<2x8x16xbf16>, vector<2x8x8xf32> -> vector<2x8x8xf32>
    %cst_15 = arith.constant 2.500000e-01 : f32
    %54 = vector.broadcast %cst_15 : f32 to vector<2x8x8xf32>
    %55 = arith.mulf %53, %54 : vector<2x8x8xf32>
    %56 = vector.broadcast %19 : vector<1x8x8xf32> to vector<2x8x8xf32>
    %57 = arith.addf %55, %56 : vector<2x8x8xf32>
    %cst_16 = arith.constant dense<0xFF800000> : vector<2x8xf32>
    %58 = vector.multi_reduction <maximumf>, %57, %cst_16 [2] : vector<2x8x8xf32> to vector<2x8xf32>
    %59 = vector.shape_cast %58 : vector<2x8xf32> to vector<2x8x1xf32>
    %60 = vector.broadcast %59 : vector<2x8x1xf32> to vector<2x8x8xf32>
    %61 = arith.subf %57, %60 : vector<2x8x8xf32>
    %62 = math.exp %61 : vector<2x8x8xf32>
    %cst_17 = arith.constant dense<0.000000e+00> : vector<2x8xf32>
    %63 = vector.multi_reduction <add>, %62, %cst_17 [2] : vector<2x8x8xf32> to vector<2x8xf32>
    %64 = vector.shape_cast %63 : vector<2x8xf32> to vector<2x8x1xf32>
    %65 = tpu.reciprocal %64 {approx = true} : vector<2x8x1xf32> -> vector<2x8x1xf32>
    %66 = arith.mulf %64, %65 : vector<2x8x1xf32>
    %cst_18 = arith.constant 2.000000e+00 : f32
    %67 = vector.broadcast %cst_18 : f32 to vector<2x8x1xf32>
    %68 = arith.subf %67, %66 : vector<2x8x1xf32>
    %69 = arith.mulf %65, %68 : vector<2x8x1xf32>
    %70 = vector.broadcast %69 : vector<2x8x1xf32> to vector<2x8x8xf32>
    %71 = arith.mulf %62, %70 : vector<2x8x8xf32>
    %72 = arith.truncf %71 : vector<2x8x8xf32> to vector<2x8x8xbf16>
    %cst_19 = arith.constant dense<0.000000e+00> : vector<2x8x16xf32>
    %73 = tpu.matmul %72, %52, %cst_19 {dimension_numbers = #tpu.dot_dimension_numbers<[2], [1], [1], [2], [0, 0, 0, 1, 1, 2], [0], [0]>} : vector<2x8x8xbf16>, vector<2x8x16xbf16>, vector<2x8x16xf32> -> vector<2x8x16xf32>
    %74 = vector.extract_strided_slice %9 {offsets = [0, 0, 32], sizes = [2, 8, 16], strides = [1, 1, 1]} : vector<2x8x128xf32> to vector<2x8x16xf32>
    %75 = arith.truncf %74 : vector<2x8x16xf32> to vector<2x8x16xbf16>
    %76 = vector.extract_strided_slice %11 {offsets = [0, 0, 32], sizes = [2, 8, 16], strides = [1, 1, 1]} : vector<2x8x128xf32> to vector<2x8x16xf32>
    %77 = arith.truncf %76 : vector<2x8x16xf32> to vector<2x8x16xbf16>
    %78 = vector.extract_strided_slice %13 {offsets = [0, 0, 32], sizes = [2, 8, 16], strides = [1, 1, 1]} : vector<2x8x128xf32> to vector<2x8x16xf32>
    %79 = arith.truncf %78 : vector<2x8x16xf32> to vector<2x8x16xbf16>
    %cst_20 = arith.constant dense<0.000000e+00> : vector<2x8x8xf32>
    %80 = tpu.matmul %75, %77, %cst_20 {dimension_numbers = #tpu.dot_dimension_numbers<[2], [2], [1], [1], [0, 0, 0, 1, 1, 1], [0], [0]>} : vector<2x8x16xbf16>, vector<2x8x16xbf16>, vector<2x8x8xf32> -> vector<2x8x8xf32>
    %cst_21 = arith.constant 2.500000e-01 : f32
    %81 = vector.broadcast %cst_21 : f32 to vector<2x8x8xf32>
    %82 = arith.mulf %80, %81 : vector<2x8x8xf32>
    %83 = vector.broadcast %19 : vector<1x8x8xf32> to vector<2x8x8xf32>
    %84 = arith.addf %82, %83 : vector<2x8x8xf32>
    %cst_22 = arith.constant dense<0xFF800000> : vector<2x8xf32>
    %85 = vector.multi_reduction <maximumf>, %84, %cst_22 [2] : vector<2x8x8xf32> to vector<2x8xf32>
    %86 = vector.shape_cast %85 : vector<2x8xf32> to vector<2x8x1xf32>
    %87 = vector.broadcast %86 : vector<2x8x1xf32> to vector<2x8x8xf32>
    %88 = arith.subf %84, %87 : vector<2x8x8xf32>
    %89 = math.exp %88 : vector<2x8x8xf32>
    %cst_23 = arith.constant dense<0.000000e+00> : vector<2x8xf32>
    %90 = vector.multi_reduction <add>, %89, %cst_23 [2] : vector<2x8x8xf32> to vector<2x8xf32>
    %91 = vector.shape_cast %90 : vector<2x8xf32> to vector<2x8x1xf32>
    %92 = tpu.reciprocal %91 {approx = true} : vector<2x8x1xf32> -> vector<2x8x1xf32>
    %93 = arith.mulf %91, %92 : vector<2x8x1xf32>
    %cst_24 = arith.constant 2.000000e+00 : f32
    %94 = vector.broadcast %cst_24 : f32 to vector<2x8x1xf32>
    %95 = arith.subf %94, %93 : vector<2x8x1xf32>
    %96 = arith.mulf %92, %95 : vector<2x8x1xf32>
    %97 = vector.broadcast %96 : vector<2x8x1xf32> to vector<2x8x8xf32>
    %98 = arith.mulf %89, %97 : vector<2x8x8xf32>
    %99 = arith.truncf %98 : vector<2x8x8xf32> to vector<2x8x8xbf16>
    %cst_25 = arith.constant dense<0.000000e+00> : vector<2x8x16xf32>
    %100 = tpu.matmul %99, %79, %cst_25 {dimension_numbers = #tpu.dot_dimension_numbers<[2], [1], [1], [2], [0, 0, 0, 1, 1, 2], [0], [0]>} : vector<2x8x8xbf16>, vector<2x8x16xbf16>, vector<2x8x16xf32> -> vector<2x8x16xf32>
    %101 = vector.extract_strided_slice %9 {offsets = [0, 0, 48], sizes = [2, 8, 16], strides = [1, 1, 1]} : vector<2x8x128xf32> to vector<2x8x16xf32>
    %102 = arith.truncf %101 : vector<2x8x16xf32> to vector<2x8x16xbf16>
    %103 = vector.extract_strided_slice %11 {offsets = [0, 0, 48], sizes = [2, 8, 16], strides = [1, 1, 1]} : vector<2x8x128xf32> to vector<2x8x16xf32>
    %104 = arith.truncf %103 : vector<2x8x16xf32> to vector<2x8x16xbf16>
    %105 = vector.extract_strided_slice %13 {offsets = [0, 0, 48], sizes = [2, 8, 16], strides = [1, 1, 1]} : vector<2x8x128xf32> to vector<2x8x16xf32>
    %106 = arith.truncf %105 : vector<2x8x16xf32> to vector<2x8x16xbf16>
    %cst_26 = arith.constant dense<0.000000e+00> : vector<2x8x8xf32>
    %107 = tpu.matmul %102, %104, %cst_26 {dimension_numbers = #tpu.dot_dimension_numbers<[2], [2], [1], [1], [0, 0, 0, 1, 1, 1], [0], [0]>} : vector<2x8x16xbf16>, vector<2x8x16xbf16>, vector<2x8x8xf32> -> vector<2x8x8xf32>
    %cst_27 = arith.constant 2.500000e-01 : f32
    %108 = vector.broadcast %cst_27 : f32 to vector<2x8x8xf32>
    %109 = arith.mulf %107, %108 : vector<2x8x8xf32>
    %110 = vector.broadcast %19 : vector<1x8x8xf32> to vector<2x8x8xf32>
    %111 = arith.addf %109, %110 : vector<2x8x8xf32>
    %cst_28 = arith.constant dense<0xFF800000> : vector<2x8xf32>
    %112 = vector.multi_reduction <maximumf>, %111, %cst_28 [2] : vector<2x8x8xf32> to vector<2x8xf32>
    %113 = vector.shape_cast %112 : vector<2x8xf32> to vector<2x8x1xf32>
    %114 = vector.broadcast %113 : vector<2x8x1xf32> to vector<2x8x8xf32>
    %115 = arith.subf %111, %114 : vector<2x8x8xf32>
    %116 = math.exp %115 : vector<2x8x8xf32>
    %cst_29 = arith.constant dense<0.000000e+00> : vector<2x8xf32>
    %117 = vector.multi_reduction <add>, %116, %cst_29 [2] : vector<2x8x8xf32> to vector<2x8xf32>
    %118 = vector.shape_cast %117 : vector<2x8xf32> to vector<2x8x1xf32>
    %119 = tpu.reciprocal %118 {approx = true} : vector<2x8x1xf32> -> vector<2x8x1xf32>
    %120 = arith.mulf %118, %119 : vector<2x8x1xf32>
    %cst_30 = arith.constant 2.000000e+00 : f32
    %121 = vector.broadcast %cst_30 : f32 to vector<2x8x1xf32>
    %122 = arith.subf %121, %120 : vector<2x8x1xf32>
    %123 = arith.mulf %119, %122 : vector<2x8x1xf32>
    %124 = vector.broadcast %123 : vector<2x8x1xf32> to vector<2x8x8xf32>
    %125 = arith.mulf %116, %124 : vector<2x8x8xf32>
    %126 = arith.truncf %125 : vector<2x8x8xf32> to vector<2x8x8xbf16>
    %cst_31 = arith.constant dense<0.000000e+00> : vector<2x8x16xf32>
    %127 = tpu.matmul %126, %106, %cst_31 {dimension_numbers = #tpu.dot_dimension_numbers<[2], [1], [1], [2], [0, 0, 0, 1, 1, 2], [0], [0]>} : vector<2x8x8xbf16>, vector<2x8x16xbf16>, vector<2x8x16xf32> -> vector<2x8x16xf32>
    %128 = vector.extract_strided_slice %9 {offsets = [0, 0, 64], sizes = [2, 8, 16], strides = [1, 1, 1]} : vector<2x8x128xf32> to vector<2x8x16xf32>
    %129 = arith.truncf %128 : vector<2x8x16xf32> to vector<2x8x16xbf16>
    %130 = vector.extract_strided_slice %11 {offsets = [0, 0, 64], sizes = [2, 8, 16], strides = [1, 1, 1]} : vector<2x8x128xf32> to vector<2x8x16xf32>
    %131 = arith.truncf %130 : vector<2x8x16xf32> to vector<2x8x16xbf16>
    %132 = vector.extract_strided_slice %13 {offsets = [0, 0, 64], sizes = [2, 8, 16], strides = [1, 1, 1]} : vector<2x8x128xf32> to vector<2x8x16xf32>
    %133 = arith.truncf %132 : vector<2x8x16xf32> to vector<2x8x16xbf16>
    %cst_32 = arith.constant dense<0.000000e+00> : vector<2x8x8xf32>
    %134 = tpu.matmul %129, %131, %cst_32 {dimension_numbers = #tpu.dot_dimension_numbers<[2], [2], [1], [1], [0, 0, 0, 1, 1, 1], [0], [0]>} : vector<2x8x16xbf16>, vector<2x8x16xbf16>, vector<2x8x8xf32> -> vector<2x8x8xf32>
    %cst_33 = arith.constant 2.500000e-01 : f32
    %135 = vector.broadcast %cst_33 : f32 to vector<2x8x8xf32>
    %136 = arith.mulf %134, %135 : vector<2x8x8xf32>
    %137 = vector.broadcast %19 : vector<1x8x8xf32> to vector<2x8x8xf32>
    %138 = arith.addf %136, %137 : vector<2x8x8xf32>
    %cst_34 = arith.constant dense<0xFF800000> : vector<2x8xf32>
    %139 = vector.multi_reduction <maximumf>, %138, %cst_34 [2] : vector<2x8x8xf32> to vector<2x8xf32>
    %140 = vector.shape_cast %139 : vector<2x8xf32> to vector<2x8x1xf32>
    %141 = vector.broadcast %140 : vector<2x8x1xf32> to vector<2x8x8xf32>
    %142 = arith.subf %138, %141 : vector<2x8x8xf32>
    %143 = math.exp %142 : vector<2x8x8xf32>
    %cst_35 = arith.constant dense<0.000000e+00> : vector<2x8xf32>
    %144 = vector.multi_reduction <add>, %143, %cst_35 [2] : vector<2x8x8xf32> to vector<2x8xf32>
    %145 = vector.shape_cast %144 : vector<2x8xf32> to vector<2x8x1xf32>
    %146 = tpu.reciprocal %145 {approx = true} : vector<2x8x1xf32> -> vector<2x8x1xf32>
    %147 = arith.mulf %145, %146 : vector<2x8x1xf32>
    %cst_36 = arith.constant 2.000000e+00 : f32
    %148 = vector.broadcast %cst_36 : f32 to vector<2x8x1xf32>
    %149 = arith.subf %148, %147 : vector<2x8x1xf32>
    %150 = arith.mulf %146, %149 : vector<2x8x1xf32>
    %151 = vector.broadcast %150 : vector<2x8x1xf32> to vector<2x8x8xf32>
    %152 = arith.mulf %143, %151 : vector<2x8x8xf32>
    %153 = arith.truncf %152 : vector<2x8x8xf32> to vector<2x8x8xbf16>
    %cst_37 = arith.constant dense<0.000000e+00> : vector<2x8x16xf32>
    %154 = tpu.matmul %153, %133, %cst_37 {dimension_numbers = #tpu.dot_dimension_numbers<[2], [1], [1], [2], [0, 0, 0, 1, 1, 2], [0], [0]>} : vector<2x8x8xbf16>, vector<2x8x16xbf16>, vector<2x8x16xf32> -> vector<2x8x16xf32>
    %155 = vector.extract_strided_slice %9 {offsets = [0, 0, 80], sizes = [2, 8, 16], strides = [1, 1, 1]} : vector<2x8x128xf32> to vector<2x8x16xf32>
    %156 = arith.truncf %155 : vector<2x8x16xf32> to vector<2x8x16xbf16>
    %157 = vector.extract_strided_slice %11 {offsets = [0, 0, 80], sizes = [2, 8, 16], strides = [1, 1, 1]} : vector<2x8x128xf32> to vector<2x8x16xf32>
    %158 = arith.truncf %157 : vector<2x8x16xf32> to vector<2x8x16xbf16>
    %159 = vector.extract_strided_slice %13 {offsets = [0, 0, 80], sizes = [2, 8, 16], strides = [1, 1, 1]} : vector<2x8x128xf32> to vector<2x8x16xf32>
    %160 = arith.truncf %159 : vector<2x8x16xf32> to vector<2x8x16xbf16>
    %cst_38 = arith.constant dense<0.000000e+00> : vector<2x8x8xf32>
    %161 = tpu.matmul %156, %158, %cst_38 {dimension_numbers = #tpu.dot_dimension_numbers<[2], [2], [1], [1], [0, 0, 0, 1, 1, 1], [0], [0]>} : vector<2x8x16xbf16>, vector<2x8x16xbf16>, vector<2x8x8xf32> -> vector<2x8x8xf32>
    %cst_39 = arith.constant 2.500000e-01 : f32
    %162 = vector.broadcast %cst_39 : f32 to vector<2x8x8xf32>
    %163 = arith.mulf %161, %162 : vector<2x8x8xf32>
    %164 = vector.broadcast %19 : vector<1x8x8xf32> to vector<2x8x8xf32>
    %165 = arith.addf %163, %164 : vector<2x8x8xf32>
    %cst_40 = arith.constant dense<0xFF800000> : vector<2x8xf32>
    %166 = vector.multi_reduction <maximumf>, %165, %cst_40 [2] : vector<2x8x8xf32> to vector<2x8xf32>
    %167 = vector.shape_cast %166 : vector<2x8xf32> to vector<2x8x1xf32>
    %168 = vector.broadcast %167 : vector<2x8x1xf32> to vector<2x8x8xf32>
    %169 = arith.subf %165, %168 : vector<2x8x8xf32>
    %170 = math.exp %169 : vector<2x8x8xf32>
    %cst_41 = arith.constant dense<0.000000e+00> : vector<2x8xf32>
    %171 = vector.multi_reduction <add>, %170, %cst_41 [2] : vector<2x8x8xf32> to vector<2x8xf32>
    %172 = vector.shape_cast %171 : vector<2x8xf32> to vector<2x8x1xf32>
    %173 = tpu.reciprocal %172 {approx = true} : vector<2x8x1xf32> -> vector<2x8x1xf32>
    %174 = arith.mulf %172, %173 : vector<2x8x1xf32>
    %cst_42 = arith.constant 2.000000e+00 : f32
    %175 = vector.broadcast %cst_42 : f32 to vector<2x8x1xf32>
    %176 = arith.subf %175, %174 : vector<2x8x1xf32>
    %177 = arith.mulf %173, %176 : vector<2x8x1xf32>
    %178 = vector.broadcast %177 : vector<2x8x1xf32> to vector<2x8x8xf32>
    %179 = arith.mulf %170, %178 : vector<2x8x8xf32>
    %180 = arith.truncf %179 : vector<2x8x8xf32> to vector<2x8x8xbf16>
    %cst_43 = arith.constant dense<0.000000e+00> : vector<2x8x16xf32>
    %181 = tpu.matmul %180, %160, %cst_43 {dimension_numbers = #tpu.dot_dimension_numbers<[2], [1], [1], [2], [0, 0, 0, 1, 1, 2], [0], [0]>} : vector<2x8x8xbf16>, vector<2x8x16xbf16>, vector<2x8x16xf32> -> vector<2x8x16xf32>
    %182 = vector.extract_strided_slice %9 {offsets = [0, 0, 96], sizes = [2, 8, 16], strides = [1, 1, 1]} : vector<2x8x128xf32> to vector<2x8x16xf32>
    %183 = arith.truncf %182 : vector<2x8x16xf32> to vector<2x8x16xbf16>
    %184 = vector.extract_strided_slice %11 {offsets = [0, 0, 96], sizes = [2, 8, 16], strides = [1, 1, 1]} : vector<2x8x128xf32> to vector<2x8x16xf32>
    %185 = arith.truncf %184 : vector<2x8x16xf32> to vector<2x8x16xbf16>
    %186 = vector.extract_strided_slice %13 {offsets = [0, 0, 96], sizes = [2, 8, 16], strides = [1, 1, 1]} : vector<2x8x128xf32> to vector<2x8x16xf32>
    %187 = arith.truncf %186 : vector<2x8x16xf32> to vector<2x8x16xbf16>
    %cst_44 = arith.constant dense<0.000000e+00> : vector<2x8x8xf32>
    %188 = tpu.matmul %183, %185, %cst_44 {dimension_numbers = #tpu.dot_dimension_numbers<[2], [2], [1], [1], [0, 0, 0, 1, 1, 1], [0], [0]>} : vector<2x8x16xbf16>, vector<2x8x16xbf16>, vector<2x8x8xf32> -> vector<2x8x8xf32>
    %cst_45 = arith.constant 2.500000e-01 : f32
    %189 = vector.broadcast %cst_45 : f32 to vector<2x8x8xf32>
    %190 = arith.mulf %188, %189 : vector<2x8x8xf32>
    %191 = vector.broadcast %19 : vector<1x8x8xf32> to vector<2x8x8xf32>
    %192 = arith.addf %190, %191 : vector<2x8x8xf32>
    %cst_46 = arith.constant dense<0xFF800000> : vector<2x8xf32>
    %193 = vector.multi_reduction <maximumf>, %192, %cst_46 [2] : vector<2x8x8xf32> to vector<2x8xf32>
    %194 = vector.shape_cast %193 : vector<2x8xf32> to vector<2x8x1xf32>
    %195 = vector.broadcast %194 : vector<2x8x1xf32> to vector<2x8x8xf32>
    %196 = arith.subf %192, %195 : vector<2x8x8xf32>
    %197 = math.exp %196 : vector<2x8x8xf32>
    %cst_47 = arith.constant dense<0.000000e+00> : vector<2x8xf32>
    %198 = vector.multi_reduction <add>, %197, %cst_47 [2] : vector<2x8x8xf32> to vector<2x8xf32>
    %199 = vector.shape_cast %198 : vector<2x8xf32> to vector<2x8x1xf32>
    %200 = tpu.reciprocal %199 {approx = true} : vector<2x8x1xf32> -> vector<2x8x1xf32>
    %201 = arith.mulf %199, %200 : vector<2x8x1xf32>
    %cst_48 = arith.constant 2.000000e+00 : f32
    %202 = vector.broadcast %cst_48 : f32 to vector<2x8x1xf32>
    %203 = arith.subf %202, %201 : vector<2x8x1xf32>
    %204 = arith.mulf %200, %203 : vector<2x8x1xf32>
    %205 = vector.broadcast %204 : vector<2x8x1xf32> to vector<2x8x8xf32>
    %206 = arith.mulf %197, %205 : vector<2x8x8xf32>
    %207 = arith.truncf %206 : vector<2x8x8xf32> to vector<2x8x8xbf16>
    %cst_49 = arith.constant dense<0.000000e+00> : vector<2x8x16xf32>
    %208 = tpu.matmul %207, %187, %cst_49 {dimension_numbers = #tpu.dot_dimension_numbers<[2], [1], [1], [2], [0, 0, 0, 1, 1, 2], [0], [0]>} : vector<2x8x8xbf16>, vector<2x8x16xbf16>, vector<2x8x16xf32> -> vector<2x8x16xf32>
    %209 = vector.extract_strided_slice %9 {offsets = [0, 0, 112], sizes = [2, 8, 16], strides = [1, 1, 1]} : vector<2x8x128xf32> to vector<2x8x16xf32>
    %210 = arith.truncf %209 : vector<2x8x16xf32> to vector<2x8x16xbf16>
    %211 = vector.extract_strided_slice %11 {offsets = [0, 0, 112], sizes = [2, 8, 16], strides = [1, 1, 1]} : vector<2x8x128xf32> to vector<2x8x16xf32>
    %212 = arith.truncf %211 : vector<2x8x16xf32> to vector<2x8x16xbf16>
    %213 = vector.extract_strided_slice %13 {offsets = [0, 0, 112], sizes = [2, 8, 16], strides = [1, 1, 1]} : vector<2x8x128xf32> to vector<2x8x16xf32>
    %214 = arith.truncf %213 : vector<2x8x16xf32> to vector<2x8x16xbf16>
    %cst_50 = arith.constant dense<0.000000e+00> : vector<2x8x8xf32>
    %215 = tpu.matmul %210, %212, %cst_50 {dimension_numbers = #tpu.dot_dimension_numbers<[2], [2], [1], [1], [0, 0, 0, 1, 1, 1], [0], [0]>} : vector<2x8x16xbf16>, vector<2x8x16xbf16>, vector<2x8x8xf32> -> vector<2x8x8xf32>
    %cst_51 = arith.constant 2.500000e-01 : f32
    %216 = vector.broadcast %cst_51 : f32 to vector<2x8x8xf32>
    %217 = arith.mulf %215, %216 : vector<2x8x8xf32>
    %218 = vector.broadcast %19 : vector<1x8x8xf32> to vector<2x8x8xf32>
    %219 = arith.addf %217, %218 : vector<2x8x8xf32>
    %cst_52 = arith.constant dense<0xFF800000> : vector<2x8xf32>
    %220 = vector.multi_reduction <maximumf>, %219, %cst_52 [2] : vector<2x8x8xf32> to vector<2x8xf32>
    %221 = vector.shape_cast %220 : vector<2x8xf32> to vector<2x8x1xf32>
    %222 = vector.broadcast %221 : vector<2x8x1xf32> to vector<2x8x8xf32>
    %223 = arith.subf %219, %222 : vector<2x8x8xf32>
    %224 = math.exp %223 : vector<2x8x8xf32>
    %cst_53 = arith.constant dense<0.000000e+00> : vector<2x8xf32>
    %225 = vector.multi_reduction <add>, %224, %cst_53 [2] : vector<2x8x8xf32> to vector<2x8xf32>
    %226 = vector.shape_cast %225 : vector<2x8xf32> to vector<2x8x1xf32>
    %227 = tpu.reciprocal %226 {approx = true} : vector<2x8x1xf32> -> vector<2x8x1xf32>
    %228 = arith.mulf %226, %227 : vector<2x8x1xf32>
    %cst_54 = arith.constant 2.000000e+00 : f32
    %229 = vector.broadcast %cst_54 : f32 to vector<2x8x1xf32>
    %230 = arith.subf %229, %228 : vector<2x8x1xf32>
    %231 = arith.mulf %227, %230 : vector<2x8x1xf32>
    %232 = vector.broadcast %231 : vector<2x8x1xf32> to vector<2x8x8xf32>
    %233 = arith.mulf %224, %232 : vector<2x8x8xf32>
    %234 = arith.truncf %233 : vector<2x8x8xf32> to vector<2x8x8xbf16>
    %cst_55 = arith.constant dense<0.000000e+00> : vector<2x8x16xf32>
    %235 = tpu.matmul %234, %214, %cst_55 {dimension_numbers = #tpu.dot_dimension_numbers<[2], [1], [1], [2], [0, 0, 0, 1, 1, 2], [0], [0]>} : vector<2x8x8xbf16>, vector<2x8x16xbf16>, vector<2x8x16xf32> -> vector<2x8x16xf32>
    %236 = tpu.concatenate %46, %73, %100, %127, %154, %181, %208, %235 in 2 : vector<2x8x16xf32>, vector<2x8x16xf32>, vector<2x8x16xf32>, vector<2x8x16xf32>, vector<2x8x16xf32>, vector<2x8x16xf32>, vector<2x8x16xf32>, vector<2x8x16xf32> -> vector<2x8x128xf32>
    %237 = tpu.concatenate %44, %71, %98, %125, %152, %179, %206, %233 in 2 : vector<2x8x8xf32>, vector<2x8x8xf32>, vector<2x8x8xf32>, vector<2x8x8xf32>, vector<2x8x8xf32>, vector<2x8x8xf32>, vector<2x8x8xf32>, vector<2x8x8xf32> -> vector<2x8x64xf32>
    %c0_56 = arith.constant 0 : index
    %c0_57 = arith.constant 0 : index
    %c0_58 = arith.constant 0 : index
    %238 = vector.load %arg7[%c0_56, %c0_57, %c0_58] : memref<2x8x64xf32, #tpu.memory_space<vmem>>, vector<2x8x64xf32>
    tpu.vector_store %arg7[%c0_56, %c0_57, %c0_58], %237 {strides = array<i32>} : memref<2x8x64xf32, #tpu.memory_space<vmem>>, vector<2x8x64xf32>,
    %239 = vector.shape_cast %236 : vector<2x8x128xf32> to vector<16x128xf32>
    %240 = arith.truncf %239 : vector<16x128xf32> to vector<16x128xbf16>
    %c0_59 = arith.constant 0 : index
    %c0_60 = arith.constant 0 : index
    %241 = vector.load %arg4[%c0_59, %c0_60] : memref<128x128xbf16, #tpu.memory_space<vmem>>, vector<128x128xbf16>
    %cst_61 = arith.constant dense<0.000000e+00> : vector<16x128xf32>
    %242 = tpu.matmul %240, %241, %cst_61 {dimension_numbers = #tpu.dot_dimension_numbers<[1], [0], [0], [1], [0, 0, 1, 1], [], []>} : vector<16x128xbf16>, vector<128x128xbf16>, vector<16x128xf32> -> vector<16x128xf32>
    %c0_62 = arith.constant 0 : index
    %c0_63 = arith.constant 0 : index
    %243 = vector.load %arg5[%c0_62, %c0_63] : memref<1x128xf32, #tpu.memory_space<vmem>>, vector<1x128xf32>
    %244 = vector.broadcast %243 : vector<1x128xf32> to vector<16x128xf32>
    %245 = arith.addf %242, %244 : vector<16x128xf32>
    %246 = vector.shape_cast %245 : vector<16x128xf32> to vector<2x8x128xf32>
    %c0_64 = arith.constant 0 : index
    %c0_65 = arith.constant 0 : index
    %c0_66 = arith.constant 0 : index
    %247 = vector.load %arg6[%c0_64, %c0_65, %c0_66] : memref<2x8x128xf32, #tpu.memory_space<vmem>>, vector<2x8x128xf32>
    tpu.vector_store %arg6[%c0_64, %c0_65, %c0_66], %246 {strides = array<i32>} : memref<2x8x128xf32, #tpu.memory_space<vmem>>, vector<2x8x128xf32>,
    return
  }
  func.func @transform_0(%arg0: i32) -> (i32, i32, i32) {
    %c0_i32 = arith.constant 0 : i32
    %c0_i32_0 = arith.constant 0 : i32
    %c0_i32_1 = arith.constant 0 : i32
    return %arg0, %c0_i32, %c0_i32_0 : i32, i32, i32
  }
  func.func @transform_1(%arg0: i32) -> (i32, i32) {
    %c0_i32 = arith.constant 0 : i32
    %c0_i32_0 = arith.constant 0 : i32
    %c0_i32_1 = arith.constant 0 : i32
    return %c0_i32, %c0_i32_0 : i32, i32
  }
  func.func @transform_2(%arg0: i32) -> (i32, i32) {
    %c0_i32 = arith.constant 0 : i32
    %c0_i32_0 = arith.constant 0 : i32
    %c0_i32_1 = arith.constant 0 : i32
    return %c0_i32, %c0_i32_0 : i32, i32
  }
  func.func @transform_3(%arg0: i32) -> (i32, i32) {
    %c0_i32 = arith.constant 0 : i32
    %c0_i32_0 = arith.constant 0 : i32
    %c0_i32_1 = arith.constant 0 : i32
    return %c0_i32, %c0_i32_0 : i32, i32
  }
  func.func @transform_4(%arg0: i32) -> (i32, i32) {
    %c0_i32 = arith.constant 0 : i32
    %c0_i32_0 = arith.constant 0 : i32
    %c0_i32_1 = arith.constant 0 : i32
    return %c0_i32, %c0_i32_0 : i32, i32
  }
  func.func @transform_5(%arg0: i32) -> (i32, i32, i32) {
    %c0_i32 = arith.constant 0 : i32
    %c0_i32_0 = arith.constant 0 : i32
    %c0_i32_1 = arith.constant 0 : i32
    return %arg0, %c0_i32, %c0_i32_0 : i32, i32, i32
  }
  func.func @transform_6(%arg0: i32) -> (i32, i32, i32) {
    %c0_i32 = arith.constant 0 : i32
    %c0_i32_0 = arith.constant 0 : i32
    %c0_i32_1 = arith.constant 0 : i32
    return %arg0, %c0_i32, %c0_i32_0 : i32, i32, i32
  }
}

</mosaic_0001>

<bundles_post_ra>
// kernel: tpu_custom_call.1
= control target key start
LH: loop header
LB: loop body
LE: loop exit
PB: predicated region body
PF: predicated region fallthrough
CT: control target
= control target key end

     0   :  { %s3283_s0 = inlined_call_operand.hbm [shape: f32[4,8,128], index: 0, kind: input, shape index: {}]   ;;  %s3284_s1 = inlined_call_operand.hbm [shape: bf16[128,384], index: 1, kind: input, shape index: {}]   ;;  %s3285_s2 = inlined_call_operand.hbm [shape: f32[1,384], index: 2, kind: input, shape index: {}]   ;;  %s3286_s3 = inlined_call_operand.hbm [shape: bf16[128,128], index: 3, kind: input, shape index: {}]   ;;  %s3287_s4 = inlined_call_operand.vmem [shape: f32[1,128], index: 4, kind: input, shape index: {}]   ;;  %s3288_s5 = inlined_call_operand.hbm [shape: f32[4,8,128], index: 5, kind: output, shape index: {0}]   ;;  %s3289_s6 = inlined_call_operand.hbm [shape: f32[4,8,64], index: 6, kind: output, shape index: {1}]  }
   0x1   :  { %3290 = sst [smem:[#allocation18_spill]] %s3283_s0 }
   0x2   :  { %12 = vsyncpa [#allocation3], 0 }
   0x3   :  { %14 = vsyncpa [#allocation3 + $0x1], 0 }
   0x4   :  { %15 = vsyncpa [#allocation6], 0 }
   0x5   :  { %16 = vsyncpa [#allocation9], 0 }
   0x6   :  { %17 = vsyncpa [#allocation4], 0 }
   0x7   :  { %19 = vsyncpa [#allocation4 + $0x1], 0 }
   0x8   :  { %20 = vsyncpa [#allocation12], 0 }
   0x9   :  { %22 = vsyncpa [#allocation12 + $0x1], 0  ;;  %s2657_s21 = smov 0   ;;  %s2659_s22 = smov 0  }
   0xa   :  { %s2661_s23 = smov 0   ;;  %s2663_s24 = smov 0  }
   0xb LB: > { %s2678_s25 = sadd.s32 4294967295, %s2598_s24   ;;  %s1952_s26 = sadd.s32 4294967294, %s2598_s24   ;;  %s2598_s24 = sphi %s2663_s24, %s3302_s24   ;;  %s2594_s23 = sphi %s2661_s23, %s3301_s23   ;;  %s2590_s22 = sphi %s2659_s22, %s3300_s22   ;;  %s2586_s21 = sphi %s2657_s21, %s3299_s21  }
   0xc   : > { %p48_p0 = scmp.ne.s32.totalorder %s2590_s22, %s2586_s21  ;;  %p49_p1 = scmp.eq.s32.totalorder %s2678_s25, 0 }
   0xd   : > { %p156_p2 = scmp.eq.s32.totalorder %s2678_s25, 1  ;;  %p162_p3 = scmp.eq.s32.totalorder %s1952_s26, 1 }
   0xe   : > { %p2687_p4 = por %p49_p1, %p48_p0  ;;  %p1953_p5 = scmp.ge.s32.totalorder %s2598_s24, 1 }
   0xf   : > { %p2692_p6 = por %p162_p3, %p48_p0  ;;  %p195_p7 = scmp.lt.s32.totalorder %s2598_s24, 3 }
  0x10   : > { %s206_s7 = sshll.u32 %s3284_s1, 4  ;;  %s2600_s9 = smov [#allocation5]   ;;  %s207_s7 = int_to_ptr.hbm [resolvable:$true] %s206_s7 }
  0x11   : > { %p2700_p8 = pnand %p1953_p5, %p195_p7  ;;  %s208_s10 = sshll.u32 %s2600_s9, 4  ;;  %s209_s10 = int_to_ptr.vmem [resolvable:$true] %s208_s10 }
  0x12   : > { %s221_s14 = sshll.u32 %s3285_s2, 4  ;;  %s2601_s15 = smov 192   ;;  %s222_s14 = int_to_ptr.hbm [resolvable:$true] %s221_s14 }
  0x13   : > { %p2189_p9 = pneg %p2700_p8  ;;  %s2602_s16 = smov 12  }
  0x14   : > { %s2603_s17 = smov [#allocation7]   ;;  %s232_s26 = sshll.u32 %s3286_s3, 4  ;;  %s233_s26 = int_to_ptr.hbm [resolvable:$true] %s232_s26 }
  0x15   : > { %p2708_p10 = pnand %p2189_p9, %p49_p1  ;;  %s223_s18 = sshll.u32 %s2603_s17, 4  ;;  %s224_s18 = int_to_ptr.vmem [resolvable:$true] %s223_s18 }
  0x16   : > { %s2604_s29 = smov [#allocation8]   ;;  %s2606_s9 = smov 4  }
  0x17   : > { %2192 = dma.hbm_to_vmem [thread:$0]  (!%p2708_p10), %s207_s7, 3072, %s209_s10, [#allocation6], %s2601_s15, %s2601_s15, %s2602_s16  }
  0x18   : > { %2195 = dma.hbm_to_vmem [thread:$0]  (!%p2708_p10), %s222_s14, 48, %s224_s18, [#allocation6]  }
  0x19   : > { %s234_s30 = sshll.u32 %s2604_s29, 4  ;;  %s2605_s7 = smov 64   ;;  %s235_s30 = int_to_ptr.vmem [resolvable:$true] %s234_s30 }
  0x1a   : > { %2198 = dma.hbm_to_vmem [thread:$0]  (!%p2708_p10), %s233_s26, 1024, %s235_s30, [#allocation9], %s2605_s7, %s2605_s7, %s2606_s9  }
  0x1b   : > { %s2726_s10 = sadd.s32 1, %s2598_s24   ;;  %s35_s13 = sadd.s32 1, %s2594_s23 }
  0x1c   : > { %s32_s12 = ssub.s32 %s2598_s24, %s2726_s10  ;;  %p42_p13 = scmp.ne.s32.totalorder %s2594_s23, %s2590_s22 }
  0x1d   : > { %p33_p12 = scmp.eq.s32.totalorder %s32_s12, 0  ;;  %p43_p0 = scmp.eq.s32.totalorder %s2598_s24, 0 }
  0x1e   : > { %p2213_p3 = scmp.lt.s32.totalorder %s2598_s24, 2  ;;  %p2740_p7 = por %p156_p2, %p42_p13 }
  0x1f   : > { %s2736_s14 = scalar_select %p33_p12, %s2594_s23, %s35_s13  }
  0x20   : > { %p44_p5 = por %p43_p0, %p42_p13  ;;  %s251_s11 = sand.u32 1, %s2594_s23  }
  0x21   : > { %s2136_s16 = sshll.u32 %s2598_s24, 4  ;;  %s1958_s17 = sshll.u32 %s251_s11, 4 }
  0x22   : > { %s3296_s0 = sld [smem:[#allocation18_spill]]  ;;  %s255_s29 = scalar_lea.vmem [#allocation2], %s1958_s17 }
  0x23   : > { %s263_s30 = sshll.u32 %s255_s29, 4  ;;  %p2751_p9 = pnand %p2213_p3, %p44_p5  ;;  %s264_s30 = int_to_ptr.vmem [resolvable:$true] %s263_s30 }
  0x24   : > { %s252_s9 = scalar_lea.sflag [#allocation3], %s251_s11 }
  0x25   : > { %p2466_p10 = pneg %p2751_p9 }
  0x28   : > { %s260_s20 = scalar_lea.hbm %s3296_s0, %s2136_s16  ;;  %s2469_s18 = scalar_lea.hbm %s3296_s0, 32 }
  0x29   : > { %s261_s26 = sshll.u32 %s260_s20, 4  ;;  %s262_s26 = int_to_ptr.hbm [resolvable:$true] %s261_s26 }
  0x2a   : > { %s2462_s12 = sshra.s32 %s262_s26, 4  ;;  %s2463_s12 = int_to_ptr.hbm [resolvable:$true] %s2462_s12 }
  0x2b   : > { %s2464_s13 = scalar_lea.hbm %s2463_s12, 16  ;;  %p2470_p0 = scmp.lt.s32.totalorder %s2463_s12, %s3296_s0 }
  0x2c   : > { %p2465_p2 = scmp.ne.s32.totalorder %s2463_s12, %s2464_s13  ;;  %p2471_p3 = scmp.lt.s32.totalorder %s2469_s18, %s2464_s13 }
  0x2e   : > { %p2467_p12 = pnand %p2466_p10, %p2465_p2  ;;  %p2472_p5 = por %p2471_p3, %p2470_p0 }
  0x30   : > { %p2468_p13 = pneg %p2467_p12 }
  0x32   : > { %p2473_p11 = pnand %p2472_p5, %p2468_p13 }
  0x34   : > { %2476 = shalt.err (!%p2473_p11)
}
  0x35   : > { %s2607_s11 = smov 128   ;;  %s2608_s29 = smov 8  }
  0x36   : > { %2202 = dma.hbm_to_vmem [thread:$0]  (!%p2751_p9), %s262_s26, 256, %s264_s30, %s252_s9, %s2607_s11, %s2607_s11, %s2608_s29  }
  0x37   : > { %275 = sbr.rel (%p2700_p8) target bundleno = 1336 (0x538), region = 40  ;;  %s2768_s16 = sand.u32 (!%p2700_p8), 1, %s2590_s22  }
  0x38   : > { %s2771_s17 = sshll.u32 (!%p2700_p8), %s2768_s16, 4  ;;  %s278_s12 = scalar_lea.sflag (!%p2700_p8), [#allocation3], %s2768_s16 }
  0x39   : > { %s281_s13 = scalar_lea.vmem (!%p2700_p8), [#allocation2], %s2771_s17 }
  0x3c   : > { %2565 = dma.done.wait (%p2687_p4), %s278_s12, 256  }
  0x3d   : > { %2567 = vsyncadd (%p2687_p4), %s278_s12, 4294967040 }
  0x3e   : > { %2569 = dma.done.wait (%p49_p1), [#allocation6], 3120  }
  0x3f   : > { %2571 = vsyncadd (%p49_p1), [#allocation6], 4294964176 }
  0x40   : > { %2573 = dma.done.wait (%p49_p1), [#allocation9], 1024  }
  0x41   : > { %2575 = vsyncadd (%p49_p1), [#allocation9], 4294966272  ;;  %v2158_v0 = vld [vmem:[#allocation5 + $0xac] sm:$0xf]  ;;  %v2056_v1 = vld [vmem:[#allocation5 + $0xb4] sm:$0xf0] }
  0x42   : > { %v2155_v2 = vld [vmem:[#allocation5 + $0x94] sm:$0xf]  ;;  %v2059_v3 = vor.u32 %v2158_v0, %v2056_v1  ;;  %v2044_v4 = vld [vmem:[#allocation5 + $0x9c] sm:$0xf0]  ;;  %v2054_v5 = vld [vmem:[#allocation5 + $0xa8] sm:$0xf] }
  0x43   : > { %v2159_v6 = vld [vmem:[#allocation5 + $0xb0] sm:$0xf0]  ;;  %v2042_v8 = vld [vmem:[#allocation5 + $0x90] sm:$0xf]  ;;  %v2047_v9 = vor.u32 %v2155_v2, %v2044_v4  ;;  %v2156_v10 = vld [vmem:[#allocation5 + $0x98] sm:$0xf0] }
  0x44   : > { %v2055_v7 = vor.u32 %v2159_v6, %v2054_v5  ;;  %520 = vmatpush.bf16.msra.mxu1 %v2059_v3  ;;  %v2152_v11 = vld [vmem:[#allocation5 + $0x7c] sm:$0xf]  ;;  %v2032_v12 = vld [vmem:[#allocation5 + $0x84] sm:$0xf0]  ;;  %v2043_v13 = vor.u32 %v2156_v10, %v2042_v8  ;;  %v2030_v14 = vld [vmem:[#allocation5 + $0x78] sm:$0xf] }
  0x45   : > { %v2153_v15 = vld [vmem:[#allocation5 + $0x80] sm:$0xf0]  ;;  %v2035_v16 = vor.u32 %v2152_v11, %v2032_v12  ;;  %v2020_v18 = vld [vmem:[#allocation5 + $0x6c] sm:$0xf0]  ;;  %v2018_v20 = vld [vmem:[#allocation5 + $0x60] sm:$0xf] }
  0x46   : > { %506 = vmatpush.bf16.msra.mxu0 %v2055_v7  ;;  %v2149_v17 = vld [vmem:[#allocation5 + $0x64] sm:$0xf]  ;;  %v2031_v19 = vor.u32 %v2153_v15, %v2030_v14  ;;  %v2150_v21 = vld [vmem:[#allocation5 + $0x68] sm:$0xf0]  ;;  %v2062_v24 = vld [vmem:[#allocation5 + $0xb0] sm:$0xf] }
  0x47   : > { %v2023_v22 = vor.u32 %v2149_v17, %v2020_v18  ;;  %v2146_v23 = vld [vmem:[#allocation5 + $0x4c] sm:$0xf]  ;;  %v2160_v25 = vld [vmem:[#allocation5 + $0xb8] sm:$0xf0]  ;;  %v2008_v26 = vld [vmem:[#allocation5 + $0x54] sm:$0xf0]  ;;  %v2019_v27 = vor.u32 %v2150_v21, %v2018_v20 }
  0x48   : > { %521 = vmatpush.bf16.msra.mxu1 %v2047_v9  ;;  %v2063_v28 = vor.u32 %v2160_v25, %v2062_v24  ;;  %v2050_v29 = vld [vmem:[#allocation5 + $0x98] sm:$0xf]  ;;  %v2157_v30 = vld [vmem:[#allocation5 + $0xa0] sm:$0xf0]  ;;  %v2006_v31 = vld [vmem:[#allocation5 + $0x48] sm:$0xf]  ;;  %v2011_v34 = vor.u32 %v2146_v23, %v2008_v26 }
  0x49   : > { %v2147_v32 = vld [vmem:[#allocation5 + $0x50] sm:$0xf0]  ;;  %v2051_v33 = vor.u32 %v2157_v30, %v2050_v29  ;;  %v2038_v35 = vld [vmem:[#allocation5 + $0x80] sm:$0xf]  ;;  %v2154_v36 = vld [vmem:[#allocation5 + $0x88] sm:$0xf0] }
  0x4a   : > { %507 = vmatpush.bf16.msra.mxu0 %v2043_v13  ;;  %534 = vmatpush.bf16.msra.mxu2 %v2063_v28  ;;  %v2143_v37 = vld [vmem:[#allocation5 + $0x34] sm:$0xf]  ;;  %v1996_v38 = vld [vmem:[#allocation5 + $0x3c] sm:$0xf0]  ;;  %v2007_v39 = vor.u32 %v2147_v32, %v2006_v31  ;;  %v1994_v40 = vld [vmem:[#allocation5 + $0x30] sm:$0xf]  ;;  %v2039_v42 = vor.u32 %v2154_v36, %v2038_v35 }
  0x4b   : > { %v2144_v41 = vld [vmem:[#allocation5 + $0x38] sm:$0xf0]  ;;  %v1999_v43 = vor.u32 %v2143_v37, %v1996_v38  ;;  %v2026_v44 = vld [vmem:[#allocation5 + $0x68] sm:$0xf]  ;;  %v2151_v45 = vld [vmem:[#allocation5 + $0x70] sm:$0xf0] }
  0x4c   : > { %522 = vmatpush.bf16.msra.mxu1 %v2035_v16  ;;  %v2140_v46 = vld [vmem:[#allocation5 + $0x1c] sm:$0xf]  ;;  %v1984_v47 = vld [vmem:[#allocation5 + $0x24] sm:$0xf0]  ;;  %v1995_v48 = vor.u32 %v2144_v41, %v1994_v40  ;;  %v1982_v49 = vld [vmem:[#allocation5 + $0x18] sm:$0xf]  ;;  %v2027_v51 = vor.u32 %v2151_v45, %v2026_v44 }
  0x4d   : > { %v2141_v50 = vld [vmem:[#allocation5 + $0x20] sm:$0xf0]  ;;  %v1987_v52 = vor.u32 %v2140_v46, %v1984_v47  ;;  %v2014_v53 = vld [vmem:[#allocation5 + $0x50] sm:$0xf]  ;;  %v2148_v54 = vld [vmem:[#allocation5 + $0x58] sm:$0xf0] }
  0x4e   : > { %508 = vmatpush.bf16.msra.mxu0 %v2031_v19  ;;  %535 = vmatpush.bf16.msra.mxu2 %v2051_v33  ;;  %v2137_v55 = vld [vmem:[#allocation5 + $0x4] sm:$0xf]  ;;  %v1972_v56 = vld [vmem:[#allocation5 + $0xc] sm:$0xf0]  ;;  %v1983_v57 = vor.u32 %v2141_v50, %v1982_v49  ;;  %v1970_v58 = vld [vmem:[#allocation5] sm:$0xf]  ;;  %v2015_v61 = vor.u32 %v2148_v54, %v2014_v53 }
  0x4f   : > { %v2138_v59 = vld [vmem:[#allocation5 + $0x8] sm:$0xf0]  ;;  %v335_v60 = vld [vmem:[%s281_s13] sm:$0xff]  ;;  %v1975_v62 = vor.u32 %v2137_v55, %v1972_v56  ;;  %v2002_v0 = vld [vmem:[#allocation5 + $0x38] sm:$0xf]  ;;  %vm558_vm0 = vcmask 130048  }
  0x50   : > { %523 = vmatpush.bf16.msra.mxu1 %v2023_v22  ;;  %v336_v63 = vld [vmem:[%s281_s13 + $0x8] sm:$0xff]  ;;  %v2145_v1 = vld [vmem:[#allocation5 + $0x40] sm:$0xf0]  ;;  %v1971_v2 = vor.u32 %v2138_v59, %v1970_v58  ;;  %v1990_v5 = vld [vmem:[#allocation5 + $0x20] sm:$0xf]  ;;  %s2609_s27 = smov 96   ;;  %v548_v59 = vlaneseq }
  0x51   : > { %v337_v3 = vpack.c.bf16 %v336_v63, %v335_v60  ;;  %v2003_v4 = vor.u32 %v2145_v1, %v2002_v0  ;;  %v2142_v6 = vld [vmem:[#allocation5 + $0x28] sm:$0xf0]  ;;  %v1978_v8 = vld [vmem:[#allocation5 + $0x8] sm:$0xf]  ;;  %v2139_v9 = vld [vmem:[#allocation5 + $0x10] sm:$0xf0] }
  0x52   : > { %509 = vmatpush.bf16.msra.mxu0 %v2019_v27  ;;  %536 = vmatpush.bf16.msra.mxu2 %v2039_v42  ;;  %v1991_v7 = vor.u32 %v2142_v6, %v1990_v5  ;;  %v1979_v10 = vor.u32 %v2139_v9, %v1978_v8  ;;  %v2791_v11 = vld [vmem:[#allocation7] sm:$0x7]  ;;  %s2610_s8 = smov 112   ;;  %s2611_s26 = smov 80   ;;  %vm635_vm1 = vcmask 1043456   ;;  %vm601_vm3 = vcmask 64512  }
  0x53   : > { %v373_v12 = vperm.slane %v2791_v11, 1  ;;  %v372_v13 = vperm.slane %v2791_v11, 0  ;;  %s2612_s30 = smov 64   ;;  %s2613_s7 = smov 48   ;;  %v374_v36 = vperm.slane %v2791_v11, 2  ;;  %vm1601_vm4 = vcmask 261120  }
  0x54   : > { %524 = vmatpush.bf16.msra.mxu1 %v2011_v34  ;;  %s2614_s9 = smov 32   ;;  %s2615_s18 = smov 16   ;;  %vm1604_vm5 = vcmask 392192   ;;  %vm1607_vm6 = vcmask 523264   ;;  %vm1610_vm7 = vcmask 654336   ;;  %vm1613_vm8 = vcmask 785408  }
  0x55   : > { %s2617_s19 = smov 8   ;;  %s2618_s20 = smov 24   ;;  %vm1616_vm9 = vcmask 916480   ;;  %vm1679_vm10 = vcmask 195584   ;;  %vm1684_vm11 = vcmask 326656   ;;  %vm1689_vm12 = vcmask 457728  }
  0x56   : > { %510 = vmatpush.bf16.msra.mxu0 %v2007_v39  ;;  %537 = vmatpush.bf16.msra.mxu2 %v2027_v51  ;;  %s2619_s11 = smov 40   ;;  %s2620_s29 = smov 56  }
  0x57   : > { %s2169_s12 = sshll.u32 %s2678_s25, 4  ;;  %s2512_s13 = scalar_lea.hbm %s3289_s6, 32 }
  0x58   : > { %525 = vmatpush.bf16.msra.mxu1 %v1999_v43 }
  0x5a   : > { %511 = vmatpush.bf16.msra.mxu0 %v1995_v48  ;;  %538 = vmatpush.bf16.msra.mxu2 %v2015_v61  ;;  %v549_v61 = vand.u32 127, %v548_v59 }
  0x5c   : > { %526 = vmatpush.bf16.msra.mxu1 %v1987_v52  ;;  %vm550_vm2 = vcmp.eq.s32.totalorder %v549_v61, 3 }
  0x5e   : > { %512 = vmatpush.bf16.msra.mxu0 %v1983_v57  ;;  %539 = vmatpush.bf16.msra.mxu2 %v2003_v4 }
  0x60   : > { %527 = vmatpush.bf16.msra.mxu1 %v1975_v62 }
  0x62   : > { %513 = vmatpush.bf16.msra.mxu0 %v1971_v2  ;;  %540 = vmatpush.bf16.msra.mxu2 %v1991_v7  ;;  %v2616_v2 = vmov 0.0  }
  0x63   : > { %528 = vmatmul.bf16.vlgmr.msra.gmra.mxu1 %v337_v3 }
  0x65   : > { %514 = vmatmul.bf16.vlgmr.msra.gmra.mxu0 %v337_v3 }
  0x66   : > { %541 = vmatpush.bf16.msra.mxu2 %v1979_v10 }
  0x69   : > { %542 = vmatmul.bf16.vlgmr.msra.gmra.mxu2 %v337_v3  ;;  %v2847_v3 = vsel %vm550_vm2, -1e+30, %v2616_v2 }
  0xe0   : > { %v529_v14 = vpop.f32.mrf.mxu1 }
  0xe1   : > { %v530_v15 = vadd.f32 %v529_v14, %v373_v12 }
  0xe2   : > { %v515_v16 = vpop.f32.mrf.mxu0 }
  0xe3   : > { %v516_v17 = vadd.f32 %v515_v16, %v372_v13  ;;  %v554_v18 = vpack.c.bf16 %v530_v15, %v530_v15 }
  0xe5   : > { %v677_v19 = vunpack.c.l.b16 %v554_v18  ;;  %v563_v20 = vsel %vm558_vm0, %v554_v18, 0  ;;  %v552_v21 = vpack.c.bf16 %v516_v17, %v516_v17 }
  0xe6   : > { %572 = vmatpush.bf16.xpose.msra.mxu3 %v563_v20 }
  0xe7   : > { %v678_v22 = vpack.c.b16 %v677_v19, %v677_v19  ;;  %v672_v26 = vunpack.c.l.b16 %v552_v21 }
  0xe8   : > { %v531_v23 = vpop.f32.mrf.mxu1 }
  0xe9   : > { %v532_v24 = vadd.f32 %v531_v23, %v373_v12  ;;  %813 = vrot.lane.b32.xlu2 %v678_v22, %s2609_s27  ;;  %679 = vrot.lane.b32.xlu0 %v678_v22, %s2610_s8  ;;  %v673_v31 = vpack.c.b16 %v672_v26, %v672_v26 }
  0xea   : > { %v517_v25 = vpop.f32.mrf.mxu0 }
  0xeb   : > { %v555_v27 = vpack.c.bf16 %v532_v24, %v532_v24  ;;  %v518_v28 = vadd.f32 %v517_v25, %v372_v13 }
  0xec   : > { %v543_v37 = vpop.f32.mrf.mxu2 }
  0xed   : > { %v706_v29 = vunpack.c.l.b16 %v555_v27  ;;  %2064 = vmatmul.msk.bf16.vlgmr.msra.gmra.mxu3 %vm558_vm0, %v552_v21  ;;  %v582_v30 = vsel %vm558_vm0, %v555_v27, 0  ;;  %v553_v33 = vpack.c.bf16 %v518_v28, %v518_v28  ;;  %v544_v38 = vadd.f32 %v543_v37, %v374_v36 }
  0xee   : > { %591 = vmatpush.bf16.xpose.msrb.mxu3 %v582_v30 }
  0xef   : > { %v707_v32 = vpack.c.b16 %v706_v29, %v706_v29  ;;  %v701_v34 = vunpack.c.l.b16 %v553_v33  ;;  %v556_v39 = vpack.c.bf16 %v544_v38, %v544_v38 }
  0xf1   : > { %708 = vrot.lane.b32.xlu1 %v707_v32, %s2610_s8  ;;  %836 = vrot.lane.b32.xlu2 %v707_v32, %s2609_s27  ;;  %v702_v35 = vpack.c.b16 %v701_v34, %v701_v34  ;;  %v637_v40 = vsel %vm635_vm1, %v556_v39, 0  ;;  %v764_v42 = vunpack.c.l.b16 %v556_v39 }
  0xf2   : > { %674 = vrot.lane.b32.xlu0 %v673_v31, %s2610_s8 }
  0xf3   : > { %v2827_v44 = vpack.c.b16 %v764_v42, %v764_v42 }
  0xf4   : > { %v545_v41 = vpop.f32.mrf.mxu2 }
  0xf5   : > { %v546_v43 = vadd.f32 %v545_v41, %v374_v36 }
  0xf6   : > { %646 = vmatpush.bf16.msra.mxu3 %v637_v40 }
  0xf7   : > { %v557_v45 = vpack.c.bf16 %v546_v43, %v546_v43 }
  0xf9   : > { %935 = vrot.lane.b32.xlu2 %v678_v22, %s2611_s26  ;;  %703 = vrot.lane.b32.xlu1 %v702_v35, %s2610_s8  ;;  %v788_v46 = vunpack.c.l.b16 %v557_v45  ;;  %v656_v55 = vsel %vm635_vm1, %v557_v45, 0 }
  0xfa   : > { %811 = vrot.lane.b32.xlu0 %v673_v31, %s2609_s27  ;;  %665 = vmatpush.bf16.msrb.mxu0 %v656_v55 }
  0xfb   : > { %v2833_v47 = vpack.c.b16 %v788_v46, %v788_v46 }
  0xfd   : > { %2065 = vmatmul.msk.bf16.vlgmr.msrb.gmra.mxu3 %vm558_vm0, %v553_v33 }
 0x101   : > { %956 = vrot.lane.b32.xlu2 %v702_v35, %s2611_s26  ;;  %834 = vrot.lane.b32.xlu1 %v702_v35, %s2609_s27 }
 0x102   : > { %958 = vrot.lane.b32.xlu0 %v707_v32, %s2611_s26 }
 0x109   : > { %1055 = vrot.lane.b32.xlu2 %v673_v31, %s2612_s30  ;;  %933 = vrot.lane.b32.xlu1 %v673_v31, %s2611_s26 }
 0x10a   : > { %1057 = vrot.lane.b32.xlu0 %v678_v22, %s2612_s30 }
 0x111   : > { %1202 = vrot.lane.b32.xlu2 %v707_v32, %s2613_s7  ;;  %1080 = vrot.lane.b32.xlu1 %v707_v32, %s2612_s30 }
 0x112   : > { %1078 = vrot.lane.b32.xlu0 %v702_v35, %s2612_s30 }
 0x119   : > { %1301 = vrot.lane.b32.xlu2 %v678_v22, %s2614_s9  ;;  %1179 = vrot.lane.b32.xlu1 %v678_v22, %s2613_s7 }
 0x11a   : > { %1177 = vrot.lane.b32.xlu0 %v673_v31, %s2613_s7 }
 0x121   : > { %1322 = vrot.lane.b32.xlu2 %v702_v35, %s2614_s9  ;;  %1200 = vrot.lane.b32.xlu1 %v702_v35, %s2613_s7 }
 0x122   : > { %1324 = vrot.lane.b32.xlu0 %v707_v32, %s2614_s9 }
 0x129   : > { %1421 = vrot.lane.b32.xlu2 %v673_v31, %s2615_s18  ;;  %1299 = vrot.lane.b32.xlu1 %v673_v31, %s2614_s9 }
 0x12a   : > { %1423 = vrot.lane.b32.xlu0 %v678_v22, %s2615_s18 }
 0x131   : > { %1446 = vrot.lane.b32.xlu1 %v707_v32, %s2615_s18  ;;  %891 = vrot.lane.b32.xlu2 %v2827_v44, %s2609_s27 }
 0x132   : > { %1444 = vrot.lane.b32.xlu0 %v702_v35, %s2615_s18 }
 0x139   : > { %790 = vrot.lane.b32.xlu1 %v2833_v47, %s2610_s8 }
 0x13a   : > { %766 = vrot.lane.b32.xlu0 %v2827_v44, %s2610_s8 }
 0x143   : > { %v814_v48 = vpop.permute.xlu2 %813 }
 0x144   : > { %v819_v49 = vsel %vm558_vm0, %v814_v48, 0 }
 0x145   : > { %828 = vmatpush.bf16.xpose.msrb.mxu1 %v819_v49 }
 0x14b   : > { %v837_v50 = vpop.permute.xlu2 %836 }
 0x14c   : > { %v842_v60 = vsel %vm558_vm0, %v837_v50, 0 }
 0x153   : > { %v936_v51 = vpop.permute.xlu2 %935 }
 0x154   : > { %v941_v52 = vsel %vm558_vm0, %v936_v51, 0 }
 0x155   : > { %950 = vmatpush.bf16.xpose.msra.mxu1 %v941_v52 }
 0x15b   : > { %v680_v53 = vpop.permute.xlu0 %679  ;;  %v957_v0 = vpop.permute.xlu2 %956 }
 0x15c   : > { %v685_v54 = vsel %vm558_vm0, %v680_v53, 0 }
 0x15d   : > { %694 = vmatpush.bf16.xpose.msrb.mxu2 %v685_v54 }
 0x163   : > { %v709_v56 = vpop.permute.xlu1 %708  ;;  %v1056_v10 = vpop.permute.xlu2 %1055 }
 0x164   : > { %v714_v57 = vsel %vm558_vm0, %v709_v56, 0  ;;  %v675_v58 = vpop.permute.xlu0 %674 }
 0x165   : > { %2068 = vmatmul.msk.bf16.vlgmr.msrb.gmra.mxu2 %vm558_vm0, %v675_v58 }
 0x166   : > { %723 = vmatpush.bf16.xpose.msra.mxu2 %v714_v57 }
 0x16b   : > { %v704_v62 = vpop.permute.xlu1 %703  ;;  %v1203_v16 = vpop.permute.xlu2 %1202 }
 0x16c   : > { %v812_v63 = vpop.permute.xlu0 %811  ;;  %v1208_v30 = vsel %vm558_vm0, %v1203_v16, 0 }
 0x16d   : > { %2072 = vmatmul.msk.bf16.vlgmr.msrb.gmra.mxu1 %vm558_vm0, %v812_v63 }
 0x16e   : > { %851 = vmatpush.bf16.xpose.msrb.mxu2 %v842_v60 }
 0x170   : > { %v574_v1 = vpop.f32.mrf.mxu3 }
 0x171   : > { %v597_v4 = vmul.f32 0.25, %v574_v1 }
 0x173   : > { %v835_v5 = vpop.permute.xlu1 %834  ;;  %v2850_v6 = vadd.f32 %v597_v4, %v2847_v3  ;;  %v1302_v24 = vpop.permute.xlu2 %1301 }
 0x174   : > { %v959_v7 = vpop.permute.xlu0 %958  ;;  %v1307_v28 = vsel %vm558_vm0, %v1302_v24, 0 }
 0x175   : > { %v964_v8 = vsel %vm558_vm0, %v959_v7, 0  ;;  %2069 = vmatmul.msk.bf16.vlgmr.msra.gmra.mxu2 %vm558_vm0, %v704_v62  ;;  %v602_v9 = vsel %vm601_vm3, %v2850_v6, -inf }
 0x176   : > { %973 = vmatpush.bf16.xpose.msra.mxu2 %v964_v8  ;;  %603 = vmax.xlane.f32.xlu1 %v602_v9 }
 0x178   : > { %v576_v11 = vpop.f32.mrf.mxu3 }
 0x17b   : > { %v934_v12 = vpop.permute.xlu1 %933  ;;  %v1323_v37 = vpop.permute.xlu2 %1322 }
 0x17c   : > { %v1058_v13 = vpop.permute.xlu0 %1057 }
 0x17d   : > { %v1063_v14 = vsel %vm558_vm0, %v1058_v13, 0  ;;  %2076 = vmatmul.msk.bf16.vlgmr.msra.gmra.mxu1 %vm558_vm0, %v934_v12 }
 0x17e   : > { %1072 = vmatpush.bf16.xpose.msrb.mxu1 %v1063_v14 }
 0x180   : > { %v593_v15 = vpop.f32.mrf.mxu3 }
 0x181   : > { %v598_v17 = vmul.f32 0.25, %v593_v15 }
 0x183   : > { %v1081_v18 = vpop.permute.xlu1 %1080  ;;  %v2859_v19 = vadd.f32 %v598_v17, %v2847_v3  ;;  %v1422_v41 = vpop.permute.xlu2 %1421 }
 0x184   : > { %v1086_v20 = vsel %vm558_vm0, %v1081_v18, 0  ;;  %v1079_v21 = vpop.permute.xlu0 %1078 }
 0x185   : > { %2073 = vmatmul.msk.bf16.vlgmr.msrb.gmra.mxu2 %vm558_vm0, %v835_v5  ;;  %v605_v22 = vsel %vm601_vm3, %v2859_v19, -inf }
 0x186   : > { %1095 = vmatpush.bf16.xpose.msrb.mxu2 %v1086_v20  ;;  %606 = vmax.xlane.f32.xlu2 %v605_v22 }
 0x188   : > { %v595_v23 = vpop.f32.mrf.mxu3 }
 0x18b   : > { %v1180_v25 = vpop.permute.xlu1 %1179  ;;  %v2906_v9 = vpop.permute.xlu2 %891 }
 0x18c   : > { %v1185_v26 = vsel %vm558_vm0, %v1180_v25, 0  ;;  %v1178_v27 = vpop.permute.xlu0 %1177 }
 0x18d   : > { %2080 = vmatmul.msk.bf16.vlgmr.msrb.gmra.mxu1 %vm558_vm0, %v1056_v10 }
 0x18e   : > { %1194 = vmatpush.bf16.xpose.msra.mxu1 %v1185_v26 }
 0x193   : > { %v1201_v31 = vpop.permute.xlu1 %1200 }
 0x194   : > { %v1325_v29 = vpop.permute.xlu0 %1324 }
 0x195   : > { %2077 = vmatmul.msk.bf16.vlgmr.msra.gmra.mxu2 %vm558_vm0, %v957_v0  ;;  %v1330_v35 = vsel %vm558_vm0, %v1325_v29, 0 }
 0x196   : > { %1316 = vmatpush.bf16.xpose.msrb.mxu1 %v1307_v28  ;;  %1217 = vmatpush.bf16.xpose.msra.mxu2 %v1208_v30 }
 0x19b   : > { %v1300_v34 = vpop.permute.xlu1 %1299 }
 0x19c   : > { %v1424_v32 = vpop.permute.xlu0 %1423 }
 0x19d   : > { %v1429_v33 = vsel %vm558_vm0, %v1424_v32, 0  ;;  %2084 = vmatmul.msk.bf16.vlgmr.msra.gmra.mxu1 %vm558_vm0, %v1178_v27 }
 0x19e   : > { %1438 = vmatpush.bf16.xpose.msra.mxu1 %v1429_v33 }
 0x1a3   : > { %v1447_v36 = vpop.permute.xlu1 %1446 }
 0x1a4   : > { %v1452_v38 = vsel %vm558_vm0, %v1447_v36, 0  ;;  %v1445_v42 = vpop.permute.xlu0 %1444 }
 0x1a5   : > { %2081 = vmatmul.msk.bf16.vlgmr.msrb.gmra.mxu2 %vm558_vm0, %v1079_v21 }
 0x1a6   : > { %1339 = vmatpush.bf16.xpose.msrb.mxu2 %v1330_v35 }
 0x1ab   : > { %v791_v39 = vpop.permute.xlu1 %790 }
 0x1ac   : > { %v796_v40 = vsel %vm635_vm1, %v791_v39, 0  ;;  %v767_v43 = vpop.permute.xlu0 %766 }
 0x1ad   : > { %2088 = vmatmul.msk.bf16.vlgmr.msrb.gmra.mxu1 %vm558_vm0, %v1300_v34  ;;  %805 = vmatpush.bf16.msra.mxu0 %v796_v40  ;;  %v772_v45 = vsel %vm635_vm1, %v767_v43, 0 }
 0x1ae   : > { %781 = vmatpush.bf16.msrb.mxu3 %v772_v45 }
 0x1b5   : > { %2085 = vmatmul.msk.bf16.vlgmr.msra.gmra.mxu2 %vm558_vm0, %v1201_v31 }
 0x1b6   : > { %1461 = vmatpush.bf16.xpose.msra.mxu2 %v1452_v38 }
 0x1bd   : > { %2092 = vmatmul.msk.bf16.vlgmr.msra.gmra.mxu1 %vm558_vm0, %v1422_v41 }
 0x1c5   : > { %2089 = vmatmul.msk.bf16.vlgmr.msrb.gmra.mxu2 %vm558_vm0, %v1323_v37 }
 0x1d5   : > { %2093 = vmatmul.msk.bf16.vlgmr.msra.gmra.mxu2 %vm558_vm0, %v1445_v42 }
 0x1e8   : > { %v696_v46 = vpop.f32.mrf.mxu2 }
 0x1e9   : > { %v729_v48 = vmul.f32 0.25, %v696_v46  ;;  %v604_v14 = vpop.xlane.xlu1 %603 }
 0x1ea   : > { %v830_v49 = vpop.f32.mrf.mxu1  ;;  %v608_v20 = vsub.f32 %v2850_v6, %v604_v14 }
 0x1eb   : > { %v857_v50 = vmul.f32 0.25, %v830_v49  ;;  %v2883_v51 = vadd.f32 %v729_v48, %v2847_v3 }
 0x1ec   : > { %v610_v25 = vmul.f32 1.442695, %v608_v20 }
 0x1ed   : > { %v733_v52 = vsel %vm601_vm3, %v2883_v51, -inf  ;;  %v2888_v53 = vadd.f32 %v857_v50, %v2847_v3 }
 0x1ee   : > { %734 = vmax.xlane.f32.xlu0 %v733_v52  ;;  %2308 = vpow2.f32 %v610_v25 }
 0x1ef   : > { %v861_v54 = vsel %vm601_vm3, %v2888_v53, -inf }
 0x1f0   : > { %v698_v55 = vpop.f32.mrf.mxu2  ;;  %862 = vmax.xlane.f32.xlu1 %v861_v54 }
 0x1f2   : > { %v832_v56 = vpop.f32.mrf.mxu1 }
 0x1f4   : > { %v2925_v30 = vpop.eup %2308 }
 0x1f5   : > { %v614_v35 = vsel %vm601_vm3, %v2925_v30, 0.0 }
 0x1f8   : > { %v725_v57 = vpop.f32.mrf.mxu2 }
 0x1f9   : > { %v730_v58 = vmul.f32 0.25, %v725_v57  ;;  %v607_v15 = vpop.xlane.xlu2 %606 }
 0x1fa   : > { %v952_v59 = vpop.f32.mrf.mxu1  ;;  %v609_v21 = vsub.f32 %v2859_v19, %v607_v15 }
 0x1fb   : > { %v2893_v60 = vadd.f32 %v730_v58, %v2847_v3  ;;  %v979_v23 = vmul.f32 0.25, %v952_v59 }
 0x1fc   : > { %v612_v26 = vmul.f32 1.442695, %v609_v21 }
 0x1fd   : > { %v736_v61 = vsel %vm601_vm3, %v2893_v60, -inf  ;;  %v2921_v28 = vadd.f32 %v979_v23, %v2847_v3 }
 0x1fe   : > { %737 = vmax.xlane.f32.xlu2 %v736_v61  ;;  %2310 = vpow2.f32 %v612_v26 }
 0x1ff   : > { %v983_v19 = vsel %vm601_vm3, %v2921_v28, -inf }
 0x200   : > { %v727_v62 = vpop.f32.mrf.mxu2 }
 0x202   : > { %912 = vrot.lane.b32.xlu0 %v2833_v47, %s2609_s27  ;;  %v954_v63 = vpop.f32.mrf.mxu1 }
 0x204   : > { %v2927_v31 = vpop.eup %2310 }
 0x205   : > { %v617_v37 = vsel %vm601_vm3, %v2927_v31, 0.0 }
 0x208   : > { %v853_v0 = vpop.f32.mrf.mxu2 }
 0x209   : > { %v858_v1 = vmul.f32 0.25, %v853_v0  ;;  %1013 = vrot.lane.b32.xlu1 %v2827_v44, %s2611_s26 }
 0x20a   : > { %v1074_v2 = vpop.f32.mrf.mxu1 }
 0x20b   : > { %v2902_v4 = vadd.f32 %v858_v1, %v2847_v3  ;;  %v1101_v33 = vmul.f32 0.25, %v1074_v2 }
 0x20d   : > { %v864_v5 = vsel %vm601_vm3, %v2902_v4, -inf  ;;  %v2934_v38 = vadd.f32 %v1101_v33, %v2847_v3 }
 0x20e   : > { %865 = vmax.xlane.f32.xlu2 %v864_v5 }
 0x20f   : > { %v1105_v43 = vsel %vm601_vm3, %v2934_v38, -inf }
 0x210   : > { %v855_v7 = vpop.f32.mrf.mxu2 }
 0x212   : > { %v1076_v8 = vpop.f32.mrf.mxu1 }
 0x218   : > { %v975_v10 = vpop.f32.mrf.mxu2 }
 0x219   : > { %v980_v16 = vmul.f32 0.25, %v975_v10 }
 0x21a   : > { %v1196_v11 = vpop.f32.mrf.mxu1 }
 0x21b   : > { %v1223_v12 = vmul.f32 0.25, %v1196_v11  ;;  %v2916_v24 = vadd.f32 %v980_v16, %v2847_v3 }
 0x21d   : > { %v2909_v13 = vadd.f32 %v1223_v12, %v2847_v3  ;;  %v986_v27 = vsel %vm601_vm3, %v2916_v24, -inf }
 0x21f   : > { %v1227_v17 = vsel %vm601_vm3, %v2909_v13, -inf }
 0x220   : > { %v977_v18 = vpop.f32.mrf.mxu2  ;;  %1228 = vmax.xlane.f32.xlu2 %v1227_v17 }
 0x222   : > { %v1198_v22 = vpop.f32.mrf.mxu1 }
 0x228   : > { %v1097_v29 = vpop.f32.mrf.mxu2  ;;  %987 = vmax.xlane.f32.xlu2 %v986_v27 }
 0x229   : > { %v1102_v45 = vmul.f32 0.25, %v1097_v29 }
 0x22a   : > { %v1318_v6 = vpop.f32.mrf.mxu1 }
 0x22b   : > { %v1345_v36 = vmul.f32 0.25, %v1318_v6  ;;  %v2949_v50 = vadd.f32 %v1102_v45, %v2847_v3 }
 0x22c   : > { %984 = vmax.xlane.f32.xlu0 %v983_v19 }
 0x22d   : > { %v2937_v39 = vadd.f32 %v1345_v36, %v2847_v3  ;;  %v1108_v56 = vsel %vm601_vm3, %v2949_v50, -inf }
 0x22f   : > { %v1349_v46 = vsel %vm601_vm3, %v2937_v39, -inf }
 0x230   : > { %v1099_v32 = vpop.f32.mrf.mxu2 }
 0x232   : > { %v1320_v34 = vpop.f32.mrf.mxu1 }
 0x233   : > { %615 = vadd.xlane.f32.xlu1 %v614_v35 }
 0x234   : > { %618 = vadd.xlane.f32.xlu0 %v617_v37 }
 0x238   : > { %v1219_v40 = vpop.f32.mrf.mxu2 }
 0x239   : > { %v1224_v41 = vmul.f32 0.25, %v1219_v40 }
 0x23a   : > { %v1440_v42 = vpop.f32.mrf.mxu1 }
 0x23b   : > { %1106 = vmax.xlane.f32.xlu1 %v1105_v43  ;;  %v2944_v48 = vadd.f32 %v1224_v41, %v2847_v3  ;;  %v1467_v55 = vmul.f32 0.25, %v1440_v42 }
 0x23c   : > { %1350 = vmax.xlane.f32.xlu0 %v1349_v46 }
 0x23d   : > { %v1230_v49 = vsel %vm601_vm3, %v2944_v48, -inf  ;;  %v2954_v57 = vadd.f32 %v1467_v55, %v2847_v3 }
 0x23e   : > { %1231 = vmax.xlane.f32.xlu2 %v1230_v49 }
 0x23f   : > { %v1471_v61 = vsel %vm601_vm3, %v2954_v57, -inf }
 0x240   : > { %v1221_v52 = vpop.f32.mrf.mxu2 }
 0x242   : > { %v1442_v54 = vpop.f32.mrf.mxu1 }
 0x244   : > { %1109 = vmax.xlane.f32.xlu0 %v1108_v56 }
 0x248   : > { %v1341_v58 = vpop.f32.mrf.mxu2 }
 0x249   : > { %v1346_v59 = vmul.f32 0.25, %v1341_v58 }
 0x24b   : > { %v2959_v62 = vadd.f32 %v1346_v59, %v2847_v3 }
 0x24c   : > { %1472 = vmax.xlane.f32.xlu0 %v1471_v61 }
 0x24d   : > { %v1352_v63 = vsel %vm601_vm3, %v2959_v62, -inf }
 0x24e   : > { %1353 = vmax.xlane.f32.xlu2 %v1352_v63 }
 0x250   : > { %v1343_v0 = vpop.f32.mrf.mxu2 }
 0x258   : > { %v1463_v1 = vpop.f32.mrf.mxu2 }
 0x259   : > { %v1468_v2 = vmul.f32 0.25, %v1463_v1 }
 0x25b   : > { %v2964_v5 = vadd.f32 %v1468_v2, %v2847_v3 }
 0x25d   : > { %v1474_v7 = vsel %vm601_vm3, %v2964_v5, -inf }
 0x25e   : > { %1475 = vmax.xlane.f32.xlu2 %v1474_v7  ;;  %v897_v7 = vsel %vm635_vm1, %v2906_v9, 0 }
 0x260   : > { %v1465_v8 = vpop.f32.mrf.mxu2  ;;  %1135 = vrot.lane.b32.xlu0 %v2827_v44, %s2612_s30 }
 0x261   : > { %v735_v10 = vpop.xlane.xlu0 %734 }
 0x262   : > { %v739_v11 = vsub.f32 %v2883_v51, %v735_v10 }
 0x263   : > { %v863_v12 = vpop.xlane.xlu1 %862 }
 0x264   : > { %v741_v14 = vmul.f32 1.442695, %v739_v11  ;;  %v867_v15 = vsub.f32 %v2888_v53, %v863_v12 }
 0x266   : > { %2312 = vpow2.f32 %v741_v14  ;;  %v869_v16 = vmul.f32 1.442695, %v867_v15 }
 0x268   : > { %2314 = vpow2.f32 %v869_v16  ;;  %1156 = vrot.lane.b32.xlu0 %v2833_v47, %s2612_s30 }
 0x26c   : > { %v2974_v3 = vpop.eup %2312 }
 0x26d   : > { %v745_v17 = vsel %vm601_vm3, %v2974_v3, 0.0 }
 0x26e   : > { %v2978_v18 = vpop.eup %2314  ;;  %746 = vadd.xlane.f32.xlu2 %v745_v17 }
 0x26f   : > { %v873_v51 = vsel %vm601_vm3, %v2978_v18, 0.0 }
 0x270   : > { %874 = vadd.xlane.f32.xlu1 %v873_v51  ;;  %1257 = vrot.lane.b32.xlu0 %v2827_v44, %s2613_s7 }
 0x271   : > { %v738_v53 = vpop.xlane.xlu2 %737 }
 0x272   : > { %v740_v27 = vsub.f32 %v2893_v60, %v738_v53 }
 0x274   : > { %v913_v21 = vpop.permute.xlu0 %912  ;;  %v743_v6 = vmul.f32 1.442695, %v740_v27 }
 0x278   : > { %1278 = vrot.lane.b32.xlu0 %v2833_v47, %s2613_s7 }
 0x27b   : > { %v2990_v23 = vpop.permute.xlu1 %1013 }
 0x280   : > { %1379 = vrot.lane.b32.xlu0 %v2827_v44, %s2614_s9 }
 0x281   : > { %v866_v20 = vpop.xlane.xlu2 %865 }
 0x282   : > { %v868_v52 = vsub.f32 %v2902_v4, %v866_v20 }
 0x293   : > { %v2988_v22 = vpop.xlane.xlu2 %1228 }
 0x29b   : > { %v988_v32 = vpop.xlane.xlu2 %987 }
 0x29c   : > { %v990_v35 = vsub.f32 %v2916_v24, %v988_v32 }
 0x29e   : > { %v993_v60 = vmul.f32 1.442695, %v990_v35 }
 0x29f   : > { %v985_v25 = vpop.xlane.xlu0 %984 }
 0x2a0   : > { %v989_v26 = vsub.f32 %v2921_v28, %v985_v25 }
 0x2a2   : > { %v991_v29 = vmul.f32 1.442695, %v989_v26 }
 0x2a4   : > { %2316 = vpow2.f32 %v991_v29 }
 0x2a6   : > { %v616_v19 = vpop.xlane.xlu1 %615 }
 0x2a7   : > { %2318 = vrcp.f32 %v616_v19  ;;  %v619_v33 = vpop.xlane.xlu0 %618 }
 0x2a8   : > { %2320 = vrcp.f32 %v619_v33 }
 0x2a9   : > { %2322 = vpow2.f32 %v743_v6 }
 0x2aa   : > { %v2994_v34 = vpop.eup %2316  ;;  %2324 = vpow2.f32 %v993_v60  ;;  %v1233_v60 = vsub.f32 %v2909_v13, %v2988_v22 }
 0x2ab   : > { %v995_v36 = vsel %vm601_vm3, %v2994_v34, 0.0 }
 0x2ac   : > { %996 = vadd.xlane.f32.xlu1 %v995_v36 }
 0x2ad   : > { %v2319_v28 = vpop.eup %2318 }
 0x2ae   : > { %v2321_v37 = vpop.eup %2320  ;;  %v622_v40 = vmul.f32 %v2319_v28, %v616_v19  ;;  %v1107_v41 = vpop.xlane.xlu1 %1106 }
 0x2af   : > { %v623_v42 = vmul.f32 %v2321_v37, %v619_v33  ;;  %v1111_v43 = vsub.f32 %v2934_v38, %v1107_v41  ;;  %v1351_v45 = vpop.xlane.xlu0 %1350  ;;  %v3000_v46 = vpop.eup %2322  ;;  %v871_v38 = vmul.f32 1.442695, %v868_v52 }
 0x2b0   : > { %v624_v49 = vsub.f32 2.0, %v622_v40  ;;  %v1355_v56 = vsub.f32 %v2937_v39, %v1351_v45  ;;  %v748_v59 = vsel %vm601_vm3, %v3000_v46, 0.0  ;;  %v3016_v2 = vpop.eup %2324  ;;  %v1019_v40 = vsel %vm635_vm1, %v2990_v23, 0 }
 0x2b1   : > { %v625_v54 = vsub.f32 2.0, %v623_v42  ;;  %v1113_v24 = vmul.f32 1.442695, %v1111_v43  ;;  %v998_v9 = vsel %vm601_vm3, %v3016_v2, 0.0  ;;  %v1232_v15 = vpop.xlane.xlu2 %1231  ;;  %v1235_v42 = vmul.f32 1.442695, %v1233_v60 }
 0x2b2   : > { %v626_v55 = vmul.f32 %v2319_v28, %v624_v49  ;;  %v1357_v0 = vmul.f32 1.442695, %v1355_v56  ;;  %v1234_v49 = vsub.f32 %v2944_v48, %v1232_v15 }
 0x2b3   : > { %v627_v58 = vmul.f32 %v2321_v37, %v625_v54  ;;  %2326 = vpow2.f32 %v1113_v24 }
 0x2b4   : > { %v3007_v61 = vmul.f32 %v2925_v30, %v626_v55  ;;  %749 = vadd.xlane.f32.xlu1 %v748_v59  ;;  %2328 = vpow2.f32 %v871_v38  ;;  %v1237_v23 = vmul.f32 1.442695, %v1234_v49 }
 0x2b5   : > { %v3010_v63 = vmul.f32 %v2927_v31, %v627_v58  ;;  %v918_v31 = vsel %vm635_vm1, %v913_v21, 0  ;;  %2330 = vpow2.f32 %v1357_v0 }
 0x2b6   : > { %v630_v4 = vpack.c.bf16 %v3007_v61, %v3007_v61 }
 0x2b7   : > { %v1110_v1 = vpop.xlane.xlu0 %1109  ;;  %v631_v39 = vpack.c.bf16 %v3010_v63, %v3010_v63 }
 0x2b8   : > { %2066 = vmatmul.msk.bf16.vlgmr.msra.gmra.mxu3 %vm601_vm3, %v630_v4  ;;  %v1112_v8 = vsub.f32 %v2949_v50, %v1110_v1 }
 0x2b9   : > { %v3021_v30 = vpop.eup %2326  ;;  %906 = vmatpush.bf16.msra.mxu3 %v897_v7  ;;  %2067 = vmatmul.msk.bf16.vlgmr.msrb.gmra.mxu0 %vm601_vm3, %v631_v39 }
 0x2ba   : > { %927 = vmatpush.bf16.msrb.mxu0 %v918_v31  ;;  %v1117_v10 = vsel %vm601_vm3, %v3021_v30, 0.0  ;;  %v1115_v11 = vmul.f32 1.442695, %v1112_v8  ;;  %v3030_v12 = vpop.eup %2328 }
 0x2bb   : > { %1118 = vadd.xlane.f32.xlu2 %v1117_v10  ;;  %v3032_v14 = vpop.eup %2330  ;;  %v876_v16 = vsel %vm601_vm3, %v3030_v12, 0.0 }
 0x2bc   : > { %999 = vadd.xlane.f32.xlu1 %v998_v9  ;;  %2332 = vpow2.f32 %v1115_v11  ;;  %v1361_v50 = vsel %vm601_vm3, %v3032_v14, 0.0 }
 0x2bf   : > { %v1473_v43 = vpop.xlane.xlu0 %1472 }
 0x2c1   : > { %v1354_v51 = vpop.xlane.xlu2 %1353 }
 0x2c2   : > { %v3038_v17 = vpop.eup %2332  ;;  %v1356_v48 = vsub.f32 %v2959_v62, %v1354_v51 }
 0x2c3   : > { %877 = vadd.xlane.f32.xlu2 %v876_v16  ;;  %v1120_v53 = vsel %vm601_vm3, %v3038_v17, 0.0 }
 0x2c4   : > { %1362 = vadd.xlane.f32.xlu1 %v1361_v50  ;;  %v1359_v56 = vmul.f32 1.442695, %v1356_v48 }
 0x2cc   : > { %1121 = vadd.xlane.f32.xlu1 %v1120_v53 }
 0x2d1   : > { %v1476_v20 = vpop.xlane.xlu2 %1475 }
 0x2d2   : > { %v1478_v21 = vsub.f32 %v2964_v5, %v1476_v20  ;;  %v1136_v22 = vpop.permute.xlu0 %1135 }
 0x2d3   : > { %v1141_v55 = vsel %vm635_vm1, %v1136_v22, 0 }
 0x2d4   : > { %v1481_v25 = vmul.f32 1.442695, %v1478_v21 }
 0x2d6   : > { %2334 = vpow2.f32 %v1481_v25 }
 0x2da   : > { %v1157_v62 = vpop.permute.xlu0 %1156 }
 0x2db   : > { %1034 = vrot.lane.b32.xlu2 %v2833_v47, %s2611_s26 }
 0x2dc   : > { %v3045_v26 = vpop.eup %2334 }
 0x2dd   : > { %v1486_v27 = vsel %vm601_vm3, %v3045_v26, 0.0 }
 0x2de   : > { %1487 = vadd.xlane.f32.xlu0 %v1486_v27 }
 0x2e1   : > { %v747_v29 = vpop.xlane.xlu2 %746 }
 0x2e2   : > { %2336 = vrcp.f32 %v747_v29  ;;  %v1258_v8 = vpop.permute.xlu0 %1257 }
 0x2e3   : > { %v875_v6 = vpop.xlane.xlu1 %874 }
 0x2e4   : > { %2338 = vrcp.f32 %v875_v6 }
 0x2e5   : > { %1400 = vrot.lane.b32.xlu1 %v2833_v47, %s2614_s9  ;;  %2340 = vpow2.f32 %v1235_v42 }
 0x2e8   : > { %v2337_v19 = vpop.eup %2336 }
 0x2e9   : > { %v753_v5 = vmul.f32 %v2337_v19, %v747_v29 }
 0x2ea   : > { %v2339_v35 = vpop.eup %2338  ;;  %v1279_v20 = vpop.permute.xlu0 %1278 }
 0x2eb   : > { %v755_v32 = vsub.f32 2.0, %v753_v5  ;;  %v881_v37 = vmul.f32 %v2339_v35, %v875_v6  ;;  %v3066_v13 = vpop.eup %2340 }
 0x2ed   : > { %v757_v33 = vmul.f32 %v2337_v19, %v755_v32  ;;  %v883_v41 = vsub.f32 2.0, %v881_v37 }
 0x2ef   : > { %v3052_v36 = vmul.f32 %v2974_v3, %v757_v33  ;;  %v885_v45 = vmul.f32 %v2339_v35, %v883_v41  ;;  %v1477_v3 = vsub.f32 %v2954_v57, %v1473_v43  ;;  %v1239_v57 = vsel %vm601_vm3, %v3066_v13, 0.0 }
 0x2f1   : > { %v761_v28 = vpack.c.bf16 %v3052_v36, %v3052_v36  ;;  %v3064_v52 = vmul.f32 %v2978_v18, %v885_v45  ;;  %v1479_v54 = vmul.f32 1.442695, %v1477_v3 }
 0x2f3   : > { %2070 = vmatmul.msk.bf16.vlgmr.msrb.gmra.mxu3 %vm601_vm3, %v761_v28  ;;  %v889_v24 = vpack.c.bf16 %v3064_v52, %v3064_v52  ;;  %2342 = vpow2.f32 %v1479_v54  ;;  %v1380_v28 = vpop.permute.xlu0 %1379 }
 0x2f4   : > { %1028 = vmatpush.bf16.msrb.mxu3 %v1019_v40  ;;  %2344 = vpow2.f32 %v1237_v23  ;;  %v1385_v45 = vsel %vm635_vm1, %v1380_v28, 0 }
 0x2f5   : > { %2346 = vpow2.f32 %v1359_v56 }
 0x2f9   : > { %v3075_v18 = vpop.eup %2342 }
 0x2fa   : > { %v3077_v58 = vpop.eup %2344  ;;  %v1483_v59 = vsel %vm601_vm3, %v3075_v18, 0.0 }
 0x2fb   : > { %v1242_v38 = vsel %vm601_vm3, %v3077_v58, 0.0  ;;  %v3083_v4 = vpop.eup %2346 }
 0x2fc   : > { %v1364_v0 = vsel %vm601_vm3, %v3083_v4, 0.0 }
 0x303   : > { %2074 = vmatmul.msk.bf16.vlgmr.msra.gmra.mxu3 %vm601_vm3, %v889_v24 }
 0x304   : > { %1150 = vmatpush.bf16.msra.mxu3 %v1141_v55  ;;  %1240 = vadd.xlane.f32.xlu2 %v1239_v57  ;;  %v1162_v55 = vsel %vm635_vm1, %v1157_v62, 0 }
 0x30c   : > { %1484 = vadd.xlane.f32.xlu2 %v1483_v59 }
 0x30f   : > { %1243 = vadd.xlane.f32.xlu1 %v1242_v38 }
 0x317   : > { %1365 = vadd.xlane.f32.xlu1 %v1364_v0 }
 0x31f   : > { %v997_v1 = vpop.xlane.xlu1 %996 }
 0x320   : > { %2348 = vrcp.f32 %v997_v1 }
 0x324   : > { %1501 = vrot.lane.b32.xlu2 %v2827_v44, %s2615_s18  ;;  %v1263_v44 = vsel %vm635_vm1, %v1258_v8, 0 }
 0x326   : > { %v2349_v39 = vpop.eup %2348 }
 0x327   : > { %v1003_v7 = vmul.f32 %v2349_v39, %v997_v1  ;;  %v750_v31 = vpop.xlane.xlu1 %749  ;;  %v1284_v1 = vsel %vm635_vm1, %v1279_v20, 0 }
 0x328   : > { %2350 = vrcp.f32 %v750_v31 }
 0x329   : > { %v1005_v10 = vsub.f32 2.0, %v1003_v7 }
 0x32b   : > { %v1007_v9 = vmul.f32 %v2349_v39, %v1005_v10 }
 0x32d   : > { %v3090_v11 = vmul.f32 %v2994_v34, %v1007_v9 }
 0x32e   : > { %v2351_v15 = vpop.eup %2350  ;;  %v1119_v16 = vpop.xlane.xlu2 %1118 }
 0x32f   : > { %v1011_v50 = vpack.c.bf16 %v3090_v11, %v3090_v11  ;;  %v754_v51 = vmul.f32 %v2351_v15, %v750_v31  ;;  %2352 = vrcp.f32 %v1119_v16 }
 0x330   : > { %1522 = vrot.lane.b32.xlu1 %v2833_v47, %s2615_s18  ;;  %v1000_v47 = vpop.xlane.xlu1 %999 }
 0x331   : > { %v756_v53 = vsub.f32 2.0, %v754_v51  ;;  %2078 = vmatmul.msk.bf16.vlgmr.msrb.gmra.mxu3 %vm601_vm3, %v1011_v50 }
 0x332   : > { %1272 = vmatpush.bf16.msrb.mxu3 %v1263_v44 }
 0x333   : > { %v758_v21 = vmul.f32 %v2351_v15, %v756_v53 }
 0x335   : > { %v2353_v34 = vpop.eup %2352  ;;  %v3099_v25 = vmul.f32 %v3000_v46, %v758_v21 }
 0x336   : > { %v1125_v27 = vmul.f32 %v2353_v34, %v1119_v16  ;;  %v3101_v29 = vpop.f32.mrf.mxu0  ;;  %v878_v6 = vpop.xlane.xlu2 %877 }
 0x337   : > { %v762_v19 = vpack.c.bf16 %v3099_v25, %v3099_v25  ;;  %2354 = vrcp.f32 %v878_v6 }
 0x338   : > { %v1127_v5 = vsub.f32 2.0, %v1125_v27  ;;  %2356 = vrcp.f32 %v1000_v47  ;;  %v1363_v3 = vpop.xlane.xlu1 %1362 }
 0x339   : > { %2071 = vmatmul.msk.bf16.vlgmr.msra.gmra.mxu0 %vm601_vm3, %v762_v19 }
 0x33a   : > { %v1129_v32 = vmul.f32 %v2353_v34, %v1127_v5 }
 0x33b   : > { %v3106_v33 = vpop.f32.mrf.mxu3 }
 0x33c   : > { %v3109_v35 = vmul.f32 %v3021_v30, %v1129_v32 }
 0x33d   : > { %v2355_v46 = vpop.eup %2354 }
 0x33e   : > { %v1133_v37 = vpack.c.bf16 %v3109_v35, %v3109_v35  ;;  %v882_v60 = vmul.f32 %v2355_v46, %v878_v6  ;;  %v669_v40 = vpop.f32.mrf.mxu0  ;;  %v1035_v41 = vpop.permute.xlu2 %1034 }
 0x33f   : > { %v1040_v42 = vsel %vm635_vm1, %v1035_v41, 0  ;;  %v2357_v54 = vpop.eup %2356 }
 0x340   : > { %v884_v43 = vsub.f32 2.0, %v882_v60  ;;  %1049 = vmatpush.bf16.msra.mxu0 %v1040_v42  ;;  %v1004_v24 = vmul.f32 %v2357_v54, %v1000_v47  ;;  %v1122_v48 = vpop.xlane.xlu1 %1121 }
 0x341   : > { %2082 = vmatmul.msk.bf16.vlgmr.msra.gmra.mxu3 %vm601_vm3, %v1133_v37  ;;  %2358 = vrcp.f32 %v1122_v48 }
 0x342   : > { %v886_v30 = vmul.f32 %v2355_v46, %v884_v43  ;;  %1394 = vmatpush.bf16.msra.mxu3 %v1385_v45  ;;  %v1006_v57 = vsub.f32 2.0, %v1004_v24 }
 0x343   : > { %v650_v49 = vpop.f32.mrf.mxu3 }
 0x344   : > { %v3117_v22 = vmul.f32 %v3030_v12, %v886_v30  ;;  %v1008_v56 = vmul.f32 %v2357_v54, %v1006_v57 }
 0x346   : > { %v890_v23 = vpack.c.bf16 %v3117_v22, %v3117_v22  ;;  %v3124_v59 = vmul.f32 %v3016_v2, %v1008_v56 }
 0x347   : > { %v2359_v38 = vpop.eup %2358 }
 0x348   : > { %v1012_v12 = vpack.c.bf16 %v3124_v59, %v3124_v59  ;;  %v1126_v0 = vmul.f32 %v2359_v38, %v1122_v48 }
 0x349   : > { %2075 = vmatmul.msk.bf16.vlgmr.msrb.gmra.mxu0 %vm601_vm3, %v890_v23 }
 0x34a   : > { %1171 = vmatpush.bf16.msrb.mxu0 %v1162_v55  ;;  %v1128_v62 = vsub.f32 2.0, %v1126_v0 }
 0x34c   : > { %v1130_v39 = vmul.f32 %v2359_v38, %v1128_v62 }
 0x34e   : > { %v3131_v7 = vmul.f32 %v3038_v17, %v1130_v39 }
 0x350   : > { %v1134_v2 = vpack.c.bf16 %v3131_v7, %v3131_v7 }
 0x351   : > { %v1488_v49 = vpop.xlane.xlu0 %1487 }
 0x357   : > { %v1401_v31 = vpop.permute.xlu1 %1400 }
 0x358   : > { %v1406_v8 = vsel %vm635_vm1, %v1401_v31, 0 }
 0x359   : > { %2079 = vmatmul.msk.bf16.vlgmr.msra.gmra.mxu0 %vm601_vm3, %v1012_v12 }
 0x35a   : > { %1293 = vmatpush.bf16.msra.mxu0 %v1284_v1 }
 0x369   : > { %2083 = vmatmul.msk.bf16.vlgmr.msrb.gmra.mxu0 %vm601_vm3, %v1134_v2 }
 0x36a   : > { %1415 = vmatpush.bf16.msrb.mxu0 %v1406_v8 }
 0x376   : > { %v3137_v10 = vpop.f32.mrf.mxu3 }
 0x377   : > { %v1241_v9 = vpop.xlane.xlu2 %1240 }
 0x378   : > { %2360 = vrcp.f32 %v1241_v9 }
 0x379   : > { %2362 = vrcp.f32 %v1363_v3 }
 0x37e   : > { %v2361_v15 = vpop.eup %2360  ;;  %v785_v16 = vpop.f32.mrf.mxu3 }
 0x37f   : > { %v1247_v50 = vmul.f32 %v2361_v15, %v1241_v9  ;;  %v1485_v51 = vpop.xlane.xlu2 %1484  ;;  %v2363_v20 = vpop.eup %2362 }
 0x380   : > { %v1369_v27 = vmul.f32 %v2363_v20, %v1363_v3 }
 0x381   : > { %v1249_v17 = vsub.f32 2.0, %v1247_v50 }
 0x382   : > { %v1244_v44 = vpop.xlane.xlu1 %1243  ;;  %v1371_v28 = vsub.f32 2.0, %v1369_v27 }
 0x383   : > { %v1251_v53 = vmul.f32 %v2361_v15, %v1249_v17  ;;  %2364 = vrcp.f32 %v1244_v44 }
 0x384   : > { %v1373_v40 = vmul.f32 %v2363_v20, %v1371_v28 }
 0x385   : > { %v3140_v21 = vmul.f32 %v3066_v13, %v1251_v53 }
 0x386   : > { %v908_v34 = vpop.f32.mrf.mxu3  ;;  %v3152_v3 = vmul.f32 %v3032_v14, %v1373_v40 }
 0x387   : > { %v1255_v6 = vpack.c.bf16 %v3140_v21, %v3140_v21  ;;  %v1502_v19 = vpop.permute.xlu2 %1501 }
 0x388   : > { %v1507_v47 = vsel %vm635_vm1, %v1502_v19, 0  ;;  %v1377_v23 = vpack.c.bf16 %v3152_v3, %v3152_v3 }
 0x389   : > { %v2365_v5 = vpop.eup %2364  ;;  %2086 = vmatmul.msk.bf16.vlgmr.msrb.gmra.mxu3 %vm601_vm3, %v1255_v6 }
 0x38a   : > { %v1248_v32 = vmul.f32 %v2365_v5, %v1244_v44  ;;  %1516 = vmatpush.bf16.msrb.mxu3 %v1507_v47  ;;  %v1366_v46 = vpop.xlane.xlu1 %1365 }
 0x38b   : > { %2366 = vrcp.f32 %v1366_v46 }
 0x38c   : > { %v1250_v37 = vsub.f32 2.0, %v1248_v32  ;;  %2368 = vrcp.f32 %v1485_v51 }
 0x38d   : > { %2370 = vrcp.f32 %v1488_v49 }
 0x38e   : > { %v1252_v13 = vmul.f32 %v2365_v5, %v1250_v37  ;;  %v910_v60 = vpop.f32.mrf.mxu3 }
 0x390   : > { %v3147_v41 = vmul.f32 %v3077_v58, %v1252_v13 }
 0x391   : > { %v2367_v42 = vpop.eup %2366 }
 0x392   : > { %v1256_v43 = vpack.c.bf16 %v3147_v41, %v3147_v41  ;;  %v1370_v45 = vmul.f32 %v2367_v42, %v1366_v46  ;;  %v2369_v30 = vpop.eup %2368 }
 0x393   : > { %v1491_v24 = vmul.f32 %v2369_v30, %v1485_v51  ;;  %v2371_v48 = vpop.eup %2370 }
 0x394   : > { %2087 = vmatmul.msk.bf16.vlgmr.msra.gmra.mxu0 %vm601_vm3, %v1256_v43  ;;  %v1372_v54 = vsub.f32 2.0, %v1370_v45  ;;  %v1492_v56 = vmul.f32 %v2371_v48, %v1488_v49 }
 0x395   : > { %v1493_v55 = vsub.f32 2.0, %v1491_v24 }
 0x396   : > { %v1374_v58 = vmul.f32 %v2367_v42, %v1372_v54  ;;  %v1494_v62 = vsub.f32 2.0, %v1492_v56 }
 0x397   : > { %v1495_v14 = vmul.f32 %v2369_v30, %v1493_v55  ;;  %v2161_v30 = vld [vmem:[#allocation8] sm:$0xff] }
 0x398   : > { %v3159_v57 = vmul.f32 %v3083_v4, %v1374_v58  ;;  %v1496_v4 = vmul.f32 %v2371_v48, %v1494_v62 }
 0x399   : > { %2090 = vmatmul.msk.bf16.vlgmr.msra.gmra.mxu3 %vm601_vm3, %v1377_v23  ;;  %v1497_v0 = vmul.f32 %v3075_v18, %v1495_v14 }
 0x39a   : > { %v1378_v38 = vpack.c.bf16 %v3159_v57, %v3159_v57  ;;  %v1498_v31 = vmul.f32 %v3045_v26, %v1496_v4 }
 0x39b   : > { %v1499_v39 = vpack.c.bf16 %v1497_v0, %v1497_v0 }
 0x39c   : > { %v1500_v2 = vpack.c.bf16 %v1498_v31, %v1498_v31 }
 0x3a2   : > { %v1523_v12 = vpop.permute.xlu1 %1522 }
 0x3a3   : > { %v1528_v1 = vsel %vm635_vm1, %v1523_v12, 0 }
 0x3a4   : > { %2091 = vmatmul.msk.bf16.vlgmr.msrb.gmra.mxu0 %vm601_vm3, %v1378_v38 }
 0x3a5   : > { %1537 = vmatpush.bf16.msra.mxu0 %v1528_v1 }
 0x3a9   : > { %2094 = vmatmul.msk.bf16.vlgmr.msrb.gmra.mxu3 %vm601_vm3, %v1499_v39 }
 0x3b4   : > { %v1030_v8 = vpop.f32.mrf.mxu3  ;;  %2095 = vmatmul.msk.bf16.vlgmr.msra.gmra.mxu0 %vm601_vm3, %v1500_v2 }
 0x3b6   : > { %v807_v9 = vpop.f32.mrf.mxu0 }
 0x3b7   : > { %v2272_v15 = vpack.i.bf16 %v807_v9, %v3137_v10 }
 0x3b9   : > { %2273 = vrot.lane.b32.xlu2 %v2272_v15, %s2615_s18 }
 0x3bc   : > { %v1032_v18 = vpop.f32.mrf.mxu3 }
 0x3be   : > { %v809_v16 = vpop.f32.mrf.mxu0 }
 0x3c4   : > { %v1152_v50 = vpop.f32.mrf.mxu3 }
 0x3c6   : > { %v929_v51 = vpop.f32.mrf.mxu0 }
 0x3c7   : > { %v2277_v17 = vpack.i.bf16 %v929_v51, %v908_v34 }
 0x3c9   : > { %2278 = vrot.lane.b32.xlu1 %v2277_v17, %s2614_s9 }
 0x3cc   : > { %v1154_v44 = vpop.f32.mrf.mxu3 }
 0x3ce   : > { %v931_v53 = vpop.f32.mrf.mxu0 }
 0x3d6   : > { %v1051_v20 = vpop.f32.mrf.mxu0 }
 0x3d7   : > { %v2282_v26 = vpack.i.bf16 %v1051_v20, %v1030_v8 }
 0x3d9   : > { %2283 = vrot.lane.b32.xlu2 %v2282_v26, %s2613_s7 }
 0x3de   : > { %v1053_v27 = vpop.f32.mrf.mxu0 }
 0x3e6   : > { %v1173_v6 = vpop.f32.mrf.mxu0 }
 0x3e7   : > { %v2287_v19 = vpack.i.bf16 %v1173_v6, %v1152_v50 }
 0x3e9   : > { %2288 = vrot.lane.b32.xlu1 %v2287_v19, %s2612_s30 }
 0x3ee   : > { %v1175_v10 = vpop.f32.mrf.mxu0 }
 0x40c   : > { %v1274_v47 = vpop.f32.mrf.mxu3 }
 0x411   : > { %v1295_v5 = vpop.f32.mrf.mxu0 }
 0x412   : > { %v2292_v32 = vpack.i.bf16 %v1295_v5, %v1274_v47 }
 0x414   : > { %2293 = vrot.lane.b32.xlu2 %v2292_v32, %s2611_s26  ;;  %v1276_v34 = vpop.f32.mrf.mxu3  ;;  %s330_s26 = scalar_lea.vmem [#allocation11], %s2771_s17 }
 0x415   : > { %s1814_s30 = sshll.u32 %s330_s26, 4  ;;  %s1815_s30 = int_to_ptr.vmem [resolvable:$true] %s1814_s30 }
 0x419   : > { %v1297_v46 = vpop.f32.mrf.mxu0 }
 0x41c   : > { %1621 = vrot.lane.b32.xlu2 %v3052_v36, %s2617_s19  ;;  %v1396_v28 = vpop.f32.mrf.mxu3 }
 0x421   : > { %v1417_v37 = vpop.f32.mrf.mxu0 }
 0x422   : > { %v2297_v13 = vpack.i.bf16 %v1417_v37, %v1396_v28 }
 0x424   : > { %1629 = vrot.lane.b32.xlu2 %v3064_v52, %s2615_s18  ;;  %2298 = vrot.lane.b32.xlu0 %v2297_v13, %s2609_s27  ;;  %v1398_v60 = vpop.f32.mrf.mxu3 }
 0x429   : > { %v1419_v40 = vpop.f32.mrf.mxu0 }
 0x42c   : > { %1639 = vrot.lane.b32.xlu2 %v3124_v59, %s2618_s20  ;;  %1631 = vrot.lane.b32.xlu0 %v3117_v22, %s2615_s18  ;;  %v1518_v42 = vpop.f32.mrf.mxu3  ;;  %v2167_v22 = vld [vmem:[#allocation8 + $0x30] sm:$0xff]  ;;  %v2166_v59 = vld [vmem:[#allocation8 + $0x28] sm:$0xff] }
 0x431   : > { %v1539_v43 = vpop.f32.mrf.mxu0 }
 0x432   : > { %v2302_v45 = vpack.i.bf16 %v1539_v43, %v1518_v42 }
 0x434   : > { %1653 = vrot.lane.b32.xlu2 %v3140_v21, %s2619_s11  ;;  %1645 = vrot.lane.b32.xlu0 %v3109_v35, %s2614_s9  ;;  %v1520_v36 = vpop.f32.mrf.mxu3  ;;  %v2168_v35 = vld [vmem:[#allocation8 + $0x38] sm:$0xff]  ;;  %v2165_v21 = vld [vmem:[#allocation8 + $0x20] sm:$0xff] }
 0x435   : > { %2303 = vrot.lane.b32.xlu1 %v2302_v45, %s2610_s8  ;;  %1763 = vmatpush.bf16.msrb.mxu1 %v2168_v35  ;;  %s1813_s8 = scalar_lea.hbm %s3289_s6, %s2169_s12 }
 0x439   : > { %v1541_v52 = vpop.f32.mrf.mxu0  ;;  %1764 = vmatpush.bf16.msrb.mxu1 %v2167_v22 }
 0x43c   : > { %1663 = vrot.lane.b32.xlu2 %v3159_v57, %s2613_s7  ;;  %1655 = vrot.lane.b32.xlu0 %v3147_v41, %s2619_s11  ;;  %v2163_v41 = vld [vmem:[#allocation8 + $0x10] sm:$0xff] }
 0x43d   : > { %1623 = vrot.lane.b32.xlu1 %v3099_v25, %s2617_s19  ;;  %1765 = vmatpush.bf16.msrb.mxu1 %v2166_v59  ;;  %v2164_v25 = vld [vmem:[#allocation8 + $0x18] sm:$0xff] }
 0x441   : > { %1766 = vmatpush.bf16.msrb.mxu1 %v2165_v21 }
 0x444   : > { %1669 = vrot.lane.b32.xlu0 %v1497_v0, %s2620_s29 }
 0x445   : > { %1637 = vrot.lane.b32.xlu1 %v3090_v11, %s2618_s20  ;;  %1767 = vmatpush.bf16.msrb.mxu1 %v2164_v25  ;;  %v2162_v11 = vld [vmem:[#allocation8 + $0x8] sm:$0xff] }
 0x449   : > { %1768 = vmatpush.bf16.msrb.mxu1 %v2163_v41 }
 0x44d   : > { %1647 = vrot.lane.b32.xlu1 %v3131_v7, %s2614_s9  ;;  %1769 = vmatpush.bf16.msrb.mxu1 %v2162_v11  ;;  %v2274_v7 = vpop.permute.xlu2 %2273  ;;  %s1785_s9 = scalar_lea.sflag [#allocation12], %s2768_s16 }
 0x44e   : > { %v2276_v23 = vunpack.i.h.bf16 %v2274_v7  ;;  %v2275_v24 = vunpack.i.l.bf16 %v2274_v7 }
 0x450   : > { %v1600_v14 = vsel %vm558_vm0, %v3101_v29, %v2276_v23  ;;  %v1599_v56 = vsel %vm558_vm0, %v3106_v33, %v2275_v24 }
 0x451   : > { %1770 = vmatpush.bf16.msrb.mxu1 %v2161_v30 }
 0x455   : > { %1661 = vrot.lane.b32.xlu1 %v3152_v3, %s2613_s7  ;;  %v2284_v49 = vpop.permute.xlu2 %2283  ;;  %v2279_v3 = vpop.permute.xlu1 %2278  ;;  %s1816_s7 = sshll.u32 %s1813_s8, 4  ;;  %s1817_s7 = int_to_ptr.hbm [resolvable:$true] %s1816_s7 }
 0x456   : > { %v2281_v58 = vunpack.i.h.bf16 %v2279_v3  ;;  %v2280_v55 = vunpack.i.l.bf16 %v2279_v3  ;;  %v2286_v38 = vunpack.i.h.bf16 %v2284_v49  ;;  %v2285_v39 = vunpack.i.l.bf16 %v2284_v49  ;;  %s2506_s18 = sshra.s32 %s1817_s7, 4  ;;  %s2507_s18 = int_to_ptr.hbm [resolvable:$true] %s2506_s18 }
 0x457   : > { %s2508_s20 = scalar_lea.hbm %s2507_s18, 16  ;;  %p2513_p11 = scmp.lt.s32.totalorder %s2507_s18, %s3289_s6 }
 0x458   : > { %v1603_v12 = vsel %vm1601_vm4, %v1600_v14, %v2281_v58  ;;  %v1602_v0 = vsel %vm1601_vm4, %v1599_v56, %v2280_v55  ;;  %p2509_p1 = scmp.ne.s32.totalorder %s2507_s18, %s2508_s20  ;;  %p2514_p9 = scmp.lt.s32.totalorder %s2512_s13, %s2508_s20 }
 0x459   : > { %v1605_v29 = vsel %vm1604_vm5, %v1602_v0, %v2285_v39  ;;  %v1606_v9 = vsel %vm1604_vm5, %v1603_v12, %v2286_v38 }
 0x45a   : > { %p2510_p4 = pnand %p2509_p1, %p2740_p7  ;;  %p2515_p2 = por %p2514_p9, %p2513_p11 }
 0x45c   : > { %p2511_p8 = pneg %p2510_p4 }
 0x45d   : > { %1671 = vrot.lane.b32.xlu1 %v1498_v31, %s2620_s29  ;;  %v2289_v57 = vpop.permute.xlu1 %2288 }
 0x45e   : > { %v2291_v1 = vunpack.i.h.bf16 %v2289_v57  ;;  %v2290_v62 = vunpack.i.l.bf16 %v2289_v57  ;;  %p2516_p10 = pnand %p2515_p2, %p2511_p8 }
 0x460   : > { %v1609_v15 = vsel %vm1607_vm6, %v1606_v9, %v2291_v1  ;;  %v1608_v18 = vsel %vm1607_vm6, %v1605_v29, %v2290_v62 }
 0x46e   : > { %v2294_v54 = vpop.permute.xlu2 %2293 }
 0x46f   : > { %v2296_v4 = vunpack.i.h.bf16 %v2294_v54  ;;  %v2295_v31 = vunpack.i.l.bf16 %v2294_v54 }
 0x471   : > { %v1612_v50 = vsel %vm1610_vm7, %v1609_v15, %v2296_v4  ;;  %v1611_v51 = vsel %vm1610_vm7, %v1608_v18, %v2295_v31 }
 0x476   : > { %v1622_v33 = vpop.permute.xlu2 %1621 }
 0x477   : > { %v1675_v28 = vsel %vm601_vm3, %v3007_v61, %v1622_v33 }
 0x47e   : > { %v1630_v47 = vpop.permute.xlu2 %1629 }
 0x47f   : > { %v1677_v13 = vsel %vm558_vm0, %v1675_v28, %v1630_v47 }
 0x486   : > { %v1640_v34 = vpop.permute.xlu2 %1639 }
 0x48e   : > { %v1654_v42 = vpop.permute.xlu2 %1653 }
 0x496   : > { %v2299_v48 = vpop.permute.xlu0 %2298  ;;  %v1664_v25 = vpop.permute.xlu2 %1663 }
 0x497   : > { %v2301_v2 = vunpack.i.h.bf16 %v2299_v48  ;;  %v2300_v8 = vunpack.i.l.bf16 %v2299_v48 }
 0x499   : > { %v1615_v53 = vsel %vm1613_vm8, %v1612_v50, %v2301_v2  ;;  %v1614_v20 = vsel %vm1613_vm8, %v1611_v51, %v2300_v8 }
 0x49e   : > { %v1632_v26 = vpop.permute.xlu0 %1631 }
 0x4a6   : > { %v1646_v5 = vpop.permute.xlu0 %1645 }
 0x4a7   : > { %v2304_v16 = vpop.permute.xlu1 %2303 }
 0x4a8   : > { %v2306_v17 = vunpack.i.h.bf16 %v2304_v16  ;;  %v2305_v44 = vunpack.i.l.bf16 %v2304_v16 }
 0x4aa   : > { %v1618_v27 = vsel %vm1616_vm9, %v1615_v53, %v2306_v17  ;;  %v1617_v6 = vsel %vm1616_vm9, %v1614_v20, %v2305_v44 }
 0x4ab   : > { %v1694_v19 = vpack.c.bf16 %v1618_v27, %v1617_v6 }
 0x4ad   : > { %1771 = vmatmul.bf16.vlgmr.msrb.gmra.mxu1 %v1694_v19 }
 0x4ae   : > { %v1656_v46 = vpop.permute.xlu0 %1655 }
 0x4af   : > { %v1624_v10 = vpop.permute.xlu1 %1623 }
 0x4b0   : > { %v1676_v40 = vsel %vm601_vm3, %v3010_v63, %v1624_v10 }
 0x4b1   : > { %v1678_v45 = vsel %vm558_vm0, %v1676_v40, %v1632_v26 }
 0x4b2   : > { %v1681_v35 = vsel %vm1679_vm10, %v1678_v45, %v1640_v34 }
 0x4b6   : > { %v1670_v52 = vpop.permute.xlu0 %1669 }
 0x4b7   : > { %v1638_v32 = vpop.permute.xlu1 %1637 }
 0x4b8   : > { %v1680_v60 = vsel %vm1679_vm10, %v1677_v13, %v1638_v32 }
 0x4b9   : > { %v1682_v43 = vsel %vm1601_vm4, %v1680_v60, %v1646_v5 }
 0x4ba   : > { %v1685_v36 = vsel %vm1684_vm11, %v1682_v43, %v1654_v42 }
 0x4bf   : > { %v1648_v37 = vpop.permute.xlu1 %1647 }
 0x4c0   : > { %v1683_v59 = vsel %vm1601_vm4, %v1681_v35, %v1648_v37 }
 0x4c1   : > { %v1686_v63 = vsel %vm1684_vm11, %v1683_v59, %v1656_v46 }
 0x4c2   : > { %v1688_v41 = vsel %vm1604_vm5, %v1686_v63, %v1664_v25 }
 0x4c7   : > { %v1662_v61 = vpop.permute.xlu1 %1661 }
 0x4c8   : > { %v1687_v22 = vsel %vm1604_vm5, %v1685_v36, %v1662_v61 }
 0x4c9   : > { %v1690_v21 = vsel %vm1689_vm12, %v1687_v22, %v1670_v52 }
 0x4ca   : > { %1692 = vst.msk [vmem:[%s330_s26] sm:$0xff] %vm1607_vm6, %v1690_v21 }
 0x4cf   : > { %v1672_v11 = vpop.permute.xlu1 %1671 }
 0x4d0   : > { %v1691_v30 = vsel %vm1689_vm12, %v1688_v41, %v1672_v11 }
 0x4d1   : > { %1693 = vst.msk [vmem:[%s330_s26 + $0x8] sm:$0xff] %vm1607_vm6, %v1691_v30 }
 0x4d2   : > { %2519 = shalt.err (!%p2516_p10)
}
 0x4d3   : > { %s2621_s26 = smov 128   ;;  %v2307_v7 = vld [vmem:[%s3287_s4] ss:$0 sm:$0xff]  ;;  %s323_s18 = scalar_lea.vmem [#allocation10], %s2771_s17 }
 0x4d4   : > { %2186 = dma.vmem_to_hbm [thread:$0]  (%p2740_p7), %s1815_s30, 256, %s1817_s7, %s1785_s9, %s2621_s26, %s2621_s26, %s2617_s19  }
 0x4d5   : > { %s1796_s27 = scalar_lea.hbm %s3288_s5, %s2169_s12  ;;  %s1797_s8 = sshll.u32 %s323_s18, 4  ;;  %s1798_s8 = int_to_ptr.vmem [resolvable:$true] %s1797_s8 }
 0x4d6   : > { %s1799_s0 = sshll.u32 %s1796_s27, 4  ;;  %s1780_s30 = scalar_lea.sflag [#allocation4], %s2768_s16  ;;  %s1800_s0 = int_to_ptr.hbm [resolvable:$true] %s1799_s0 }
 0x4d7   : > { %s2534_s7 = sshra.s32 %s1800_s0, 4  ;;  %s2540_s11 = scalar_lea.hbm %s3288_s5, 32  ;;  %s2535_s7 = int_to_ptr.hbm [resolvable:$true] %s2534_s7 }
 0x4d8   : > { %s2536_s9 = scalar_lea.hbm %s2535_s7, 16  ;;  %p2541_p3 = scmp.lt.s32.totalorder %s2535_s7, %s3288_s5 }
 0x4d9   : > { %p2537_p12 = scmp.ne.s32.totalorder %s2535_s7, %s2536_s9  ;;  %p2542_p5 = scmp.lt.s32.totalorder %s2540_s11, %s2536_s9 }
 0x4db   : > { %p2538_p13 = pnand %p2537_p12, %p2740_p7  ;;  %p2543_p1 = por %p2542_p5, %p2541_p3 }
 0x4dd   : > { %p2539_p0 = pneg %p2538_p13 }
 0x4df   : > { %p2544_p4 = pnand %p2543_p1, %p2539_p0 }
 0x52a   : > { %v1772_v49 = vpop.f32.mrf.mxu1 }
 0x52b   : > { %v1773_v3 = vadd.f32 %v2307_v7, %v1772_v49 }
 0x52d   : > { %1777 = vst [vmem:[%s323_s18] sm:$0xff] %v1773_v3 }
 0x532   : > { %v1774_v54 = vpop.f32.mrf.mxu1 }
 0x533   : > { %v1775_v23 = vadd.f32 %v2307_v7, %v1774_v54 }
 0x535   : > { %1778 = vst [vmem:[%s323_s18 + $0x8] sm:$0xff] %v1775_v23 }
 0x536   : > { %2547 = shalt.err (!%p2544_p4)
}
 0x537   : > { %2185 = dma.vmem_to_hbm [thread:$0]  (%p2740_p7), %s1798_s8, 256, %s1800_s0, %s1780_s30, %s2621_s26, %s2621_s26, %s2617_s19  }
 0x538 PF: > { %s1831_s16 = sand.u32 1, %s2586_s21   ;;  %p3298_p8 = scmp.ge.s32.totalorder %s2598_s24, 2 }
 0x539   : > { %s1832_s18 = scalar_lea.sflag [#allocation4], %s1831_s16 }
 0x53a   : > { %p2204_p11 = pnand %p3298_p8, %p2692_p6 }
 0x53c   : > { %p2205_p9 = pneg %p2204_p11 }
 0x53e   : > { %2577 = dma.done.wait (%p2205_p9), %s1832_s18, 256  }
 0x53f   : > { %2579 = vsyncadd (%p2205_p9), %s1832_s18, 4294967040  ;;  %s1842_s20 = scalar_lea.sflag [#allocation12], %s1831_s16 }
 0x540   : > { %2581 = dma.done.wait (%p2205_p9), %s1842_s20, 256  }
 0x541   : > { %2583 = vsyncadd (%p2205_p9), %s1842_s20, 4294967040  ;;  %p25_p7 = scmp.ge.s32.totalorder %s2726_s10, 4   ;;  %s3299_s21 = smov %s2590_s22 }
 0x542   : > { %s3300_s22 = smov %s2594_s23  ;;  %s3301_s23 = smov %s2736_s14 }
 0x543   : > { %s3302_s24 = smov %s2726_s10  ;;  %27 = sbr.rel (!%p25_p7) target bundleno = 11 (0xb), region = 114 }
 0x548   :  { %1848 = vsyncpa [#allocation3], 1 }
 0x549   :  { %1850 = vsyncpa [#allocation3 + $0x1], 1 }
 0x54a   :  { %1851 = vsyncpa [#allocation6], 1 }
 0x54b   :  { %1852 = vsyncpa [#allocation9], 1 }
 0x54c   :  { %1853 = vsyncpa [#allocation4], 1 }
 0x54d   :  { %1855 = vsyncpa [#allocation4 + $0x1], 1 }
 0x54e   :  { %1856 = vsyncpa [#allocation12], 1 }
 0x54f   :  { %1858 = vsyncpa [#allocation12 + $0x1], 1 }

</bundles_post_ra>
